<compile_context>
chip_gen: v5e
topology: v5e:2x2
jax: 0.10.0
libtpu: 0.0.40
codegen_flags: <defaults>
</compile_context>

<pallas_src>
import functools

import jax
import jax.numpy as jnp
from jax import lax
from jax.experimental import pallas as pl
from jax.experimental.pallas import tpu as pltpu


def _tgram_kernel(xc_ref, wext_ref, gamma_ref, beta_ref, wenc_ref, o_ref, *,
                  ln_eps, neg_slope, r, n_chunks_p):
    # xc_ref   : (Bb*n_chunks_p, hop)  bf16  hop-chunks of the padded waveform (Bb samples)
    # wext_ref : (r*C, hop)            bf16  extractor weight, taps stacked along N
    # gamma_ref: (L, F, 1)             f32   LayerNorm scale (per frame)
    # beta_ref : (L, F, 1)             f32   LayerNorm shift (per frame)
    # wenc_ref : (L, 3*C, C)           bf16  encoder conv weight, taps stacked along N
    # o_ref    : (Bb, F, C)            f32   frames on sublanes, channels on lanes
    Bb, F, C = o_ref.shape
    L = wenc_ref.shape[0]
    total_rows = xc_ref.shape[0]          # Bb * n_chunks_p
    BbF = Bb * F

    # Contract the LAST dim of both operands -> MXU-direct, no transposes.
    dot_ll = functools.partial(
        lax.dot_general,
        dimension_numbers=(((1,), (1,)), ((), ())),
        preferred_element_type=jnp.float32)

    # ---- conv_extrctor: Conv1d(1, C, win, stride=hop, pad=win//2, bias=False) ----
    # One wide-N bf16 matmul over every chunk row (M = Bb*n_chunks_p, N = r*C), then
    # combine the r tap slices by rolling the *result* on the (otherwise idle) XLU;
    # the chunk-count is padded to a multiple of 8 so no roll wraps across a sample.
    P = dot_ll(xc_ref[...], wext_ref[...])                    # (Bb*ncp, r*C) f32
    h_acc = P[:, 0:C]
    for i in range(1, r):
        h_acc = h_acc + pltpu.roll(P[:, i * C:(i + 1) * C],
                                   shift=total_rows - i, axis=0)
    h3 = h_acc.reshape(Bb, n_chunks_p, C)[:, 0:F, :]          # (Bb, F, C) f32

    # Per-sample frame-boundary masks for the k=3 conv (flat Bb*F rows).
    t_idx = lax.broadcasted_iota(jnp.int32, (BbF, 1), 0) % F
    m_prev = (t_idx > 0).astype(jnp.float32)                  # drop tap t-1 at t == 0
    m_next = (t_idx < F - 1).astype(jnp.float32)              # drop tap t+1 at t == F-1
    inv_f = jnp.float32(1.0 / F)

    # ---- conv_encoder: L x (LayerNorm(F) -> LeakyReLU(0.2) -> Conv1d(C, C, 3, pad=1)) ----
    for l in range(L):
        # One-pass LayerNorm statistics over frames (per sample, per channel).
        s1 = jnp.sum(h3, axis=1, keepdims=True)               # (Bb, 1, C)
        s2 = jnp.sum(h3 * h3, axis=1, keepdims=True)
        mean = s1 * inv_f
        var = jnp.maximum(s2 * inv_f - mean * mean, 0.0)
        y = (h3 - mean) * lax.rsqrt(var + ln_eps)             # rsqrt -> EUP slot
        y = y * gamma_ref[l] + beta_ref[l]                    # per-frame affine, (F,1) bcast
        y = jnp.where(y > 0, y, neg_slope * y)                # LeakyReLU(0.2)

        # Fused 3-tap conv: one wide-N bf16 matmul (M = Bb*F, N = 3C), taps recombined
        # with +/-1 sublane rolls of the result + per-sample boundary masks.
        yb = y.reshape(BbF, C).astype(jnp.bfloat16)
        z = dot_ll(yb, wenc_ref[l])                           # (Bb*F, 3C) f32
        h_flat = (z[:, C:2 * C]
                  + m_prev * pltpu.roll(z[:, 0:C], shift=1, axis=0)
                  + m_next * pltpu.roll(z[:, 2 * C:3 * C], shift=BbF - 1, axis=0))
        h3 = h_flat.reshape(Bb, F, C)

    o_ref[...] = h3.astype(o_ref.dtype)


def tgram_net_forward(x, w_ext, gammas, betas, w_enc, *,
                      win_len, hop_len, neg_slope=0.2, ln_eps=1e-5, block_b=2):
    """x: (B, 1, T) f32. w_ext: (mel_bins, win_len). gammas/betas: (L, frames).
    w_enc: (L, mel_bins, mel_bins, 3). Returns (B, mel_bins, frames) f32."""
    B, cin, T = x.shape
    assert cin == 1
    C, win = w_ext.shape
    assert win == win_len
    L = w_enc.shape[0]

    pad = win_len // 2
    # TODO(synk): general T / odd win_len (trailing partial hop-chunk) is not handled;
    # the kernel assumes win_len % hop_len == 0 and (T + 2*pad) % hop_len == 0.
    assert win_len % hop_len == 0
    r = win_len // hop_len
    l_pad = T + 2 * pad
    assert l_pad % hop_len == 0
    n_chunks = l_pad // hop_len
    frames = (l_pad - win_len) // hop_len + 1
    assert frames == n_chunks - r + 1
    assert gammas.shape == (L, frames) and betas.shape == (L, frames)
    assert w_enc.shape == (L, C, C, 3)
    assert B % block_b == 0
    # TODO(synk): frames not a multiple of 8 (e.g. the real 313) would need frame
    # padding + LN masking to keep the in-kernel (Bb*F, C) <-> (Bb, F, C) views aligned.
    assert frames % 8 == 0

    # Pad the chunk count to a sublane multiple so all in-kernel views stay
    # tile-aligned; the extra chunks are zero and never feed any output frame.
    n_chunks_p = ((n_chunks + 7) // 8) * 8

    # Layout / precision plumbing (cheap, fuses in XLA): pad + chunk + bf16-cast the
    # waveform; stack tap weights along N; column-shaped per-frame LN params.
    # TODO(synk): the pad/chunk/cast and the final output transpose could be folded
    # into the kernel (saves one HBM round trip, mostly relevant on v5e at real sizes).
    xp = jnp.pad(x[:, 0, :], ((0, 0), (pad, n_chunks_p * hop_len - T - pad)))
    x_chunks = xp.reshape(B * n_chunks_p, hop_len).astype(jnp.bfloat16)

    w_ext_s = (jnp.transpose(w_ext.reshape(C, r, hop_len), (1, 0, 2))
               .reshape(r * C, hop_len).astype(jnp.bfloat16))            # (r*C, hop)
    w_enc_s = (jnp.transpose(w_enc, (0, 3, 1, 2))
               .reshape(L, 3 * C, C).astype(jnp.bfloat16))               # (L, 3C, C)
    gamma_col = gammas[..., None].astype(jnp.float32)                    # (L, F, 1)
    beta_col = betas[..., None].astype(jnp.float32)

    kernel = functools.partial(_tgram_kernel, ln_eps=ln_eps, neg_slope=neg_slope,
                               r=r, n_chunks_p=n_chunks_p)

    out_fc = pl.pallas_call(
        kernel,
        out_shape=jax.ShapeDtypeStruct((B, frames, C), jnp.float32),
        grid=(B // block_b,),
        in_specs=[
            pl.BlockSpec((block_b * n_chunks_p, hop_len), lambda b: (b, 0)),
            pl.BlockSpec((r * C, hop_len), lambda b: (0, 0)),
            pl.BlockSpec((L, frames, 1), lambda b: (0, 0, 0)),
            pl.BlockSpec((L, frames, 1), lambda b: (0, 0, 0)),
            pl.BlockSpec((L, 3 * C, C), lambda b: (0, 0, 0)),
        ],
        out_specs=pl.BlockSpec((block_b, frames, C), lambda b: (b, 0, 0)),
        compiler_params=pltpu.CompilerParams(
            dimension_semantics=("parallel",),       # >= 2 steps -> both v7x TCs busy
            vmem_limit_bytes=32 * 1024 * 1024),      # plenty for these block sizes on all gens
    )(x_chunks, w_ext_s, gamma_col, beta_col, w_enc_s)

    # (B, F, C) -> (B, C, F) to match the PyTorch module output layout.  The kernel
    # keeps channels (=128) on lanes so its stores stay lane-dense; this tiny
    # transpose lives in the wrapper.
    return jnp.transpose(out_fc, (0, 2, 1))


def _ref_forward(x, w_ext, gammas, betas, w_enc, *, win_len, hop_len,
                 neg_slope=0.2, ln_eps=1e-5):
    """Pure-JAX f32 (HIGHEST precision) reference of TgramNet.forward."""
    pad = win_len // 2
    xp = jnp.pad(x[:, 0, :], ((0, 0), (pad, pad)))
    frames = (xp.shape[1] - win_len) // hop_len + 1
    idx = jnp.arange(frames)[:, None] * hop_len + jnp.arange(win_len)[None, :]
    patches = xp[:, idx]                                                 # (B, F, win)
    h = jnp.einsum('bfw,cw->bcf', patches, w_ext,
                   precision=jax.lax.Precision.HIGHEST)                  # (B, C, F)
    for l in range(w_enc.shape[0]):
        mean = h.mean(axis=-1, keepdims=True)
        var = ((h - mean) ** 2).mean(axis=-1, keepdims=True)
        y = (h - mean) / jnp.sqrt(var + ln_eps) * gammas[l] + betas[l]
        y = jnp.where(y > 0, y, neg_slope * y)
        yp = jnp.pad(y, ((0, 0), (0, 0), (1, 1)))
        h = sum(jnp.einsum('oi,bif->bof', w_enc[l, :, :, k], yp[:, :, k:k + frames],
                           precision=jax.lax.Precision.HIGHEST)
                for k in range(3))
    return h


if __name__ == "__main__":
    # Small config consistent with the module: mel_bins kept at the module default
    # of 128 so the channel/lane axis is lane-dense; frames / win / hop scaled down.
    num_layer = 3
    mel_bins = 128
    win_len = 64
    hop_len = 32
    frames = 16
    T = hop_len * (frames - 1)        # 480 -> frames = (T + 2*pad - win)/hop + 1 = 16
    B = 4                             # two batch-blocks of 2 -> grid length 2

    key = jax.random.PRNGKey(0)
    kx, kw1, kg, kb, kw2 = jax.random.split(key, 5)

    x = jax.random.normal(kx, (B, 1, T), jnp.float32)
    w_ext = 0.05 * jax.random.normal(kw1, (mel_bins, win_len), jnp.float32)
    gammas = 1.0 + 0.1 * jax.random.normal(kg, (num_layer, frames), jnp.float32)
    betas = 0.1 * jax.random.normal(kb, (num_layer, frames), jnp.float32)
    w_enc = 0.05 * jax.random.normal(kw2, (num_layer, mel_bins, mel_bins, 3), jnp.float32)

    fwd = jax.jit(lambda x_, we_, g_, b_, wc_: tgram_net_forward(
        x_, we_, g_, b_, wc_, win_len=win_len, hop_len=hop_len, block_b=2))
    out = fwd(x, w_ext, gammas, betas, w_enc)
    jax.block_until_ready(out)

    ref = _ref_forward(x, w_ext, gammas, betas, w_enc,
                       win_len=win_len, hop_len=hop_len)

    assert out.shape == (B, mel_bins, frames)
    # bf16 MXU operands (intentional, per perf review) -> looser tolerance than pure f32.
    max_err = float(jnp.max(jnp.abs(out - ref)))
    assert jnp.allclose(out, ref, atol=8e-2, rtol=8e-2), (
        "mismatch vs reference, max abs err = %f" % max_err)
    print("KERNEL_OK")
</pallas_src>

<mosaic_0001>
module attributes {stable_mosaic.version = 11 : i64} {
  func.func @_tgram_kernel(%arg0: i32, %arg1: memref<48x32xbf16, #tpu.memory_space<vmem>>, %arg2: memref<256x32xbf16, #tpu.memory_space<vmem>>, %arg3: memref<3x16x1xf32, #tpu.memory_space<vmem>>, %arg4: memref<3x16x1xf32, #tpu.memory_space<vmem>>, %arg5: memref<3x384x128xbf16, #tpu.memory_space<vmem>>, %arg6: memref<2x16x128xf32, #tpu.memory_space<vmem>>) attributes {dimension_semantics = [#tpu.dimension_semantics<parallel>], iteration_bounds = array<i64: 2>, scalar_prefetch = 0 : i64, scratch_operands = 0 : i64, tpu.core_type = #tpu.core_type<tc>, window_params = [{transform_indices = @transform_0, window_bounds = array<i64: 48, 32>}, {pipeline_mode = #tpu.pipeline_mode<synchronous>, transform_indices = @transform_1, window_bounds = array<i64: 256, 32>}, {pipeline_mode = #tpu.pipeline_mode<synchronous>, transform_indices = @transform_2, window_bounds = array<i64: 3, 16, 1>}, {pipeline_mode = #tpu.pipeline_mode<synchronous>, transform_indices = @transform_3, window_bounds = array<i64: 3, 16, 1>}, {pipeline_mode = #tpu.pipeline_mode<synchronous>, transform_indices = @transform_4, window_bounds = array<i64: 3, 384, 128>}, {transform_indices = @transform_5, window_bounds = array<i64: 2, 16, 128>}]} {
    %c0 = arith.constant 0 : index
    %c0_0 = arith.constant 0 : index
    %0 = vector.load %arg1[%c0, %c0_0] : memref<48x32xbf16, #tpu.memory_space<vmem>>, vector<48x32xbf16>
    %c0_1 = arith.constant 0 : index
    %c0_2 = arith.constant 0 : index
    %1 = vector.load %arg2[%c0_1, %c0_2] : memref<256x32xbf16, #tpu.memory_space<vmem>>, vector<256x32xbf16>
    %cst = arith.constant dense<0.000000e+00> : vector<48x256xf32>
    %2 = tpu.matmul %0, %1, %cst {dimension_numbers = #tpu.dot_dimension_numbers<[1], [1], [0], [0], [0, 0, 1, 0], [], []>} : vector<48x32xbf16>, vector<256x32xbf16>, vector<48x256xf32> -> vector<48x256xf32>
    %3 = vector.extract_strided_slice %2 {offsets = [0, 0], sizes = [48, 128], strides = [1, 1]} : vector<48x256xf32> to vector<48x128xf32>
    %4 = vector.extract_strided_slice %2 {offsets = [0, 128], sizes = [48, 128], strides = [1, 1]} : vector<48x256xf32> to vector<48x128xf32>
    %c47_i32 = arith.constant 47 : i32
    %5 = tpu.dynamic_rotate %4 by %c47_i32 dim 0 : vector<48x128xf32>, i32 -> vector<48x128xf32>
    %6 = arith.addf %3, %5 : vector<48x128xf32>
    %7 = vector.shape_cast %6 : vector<48x128xf32> to vector<2x24x128xf32>
    %8 = vector.extract_strided_slice %7 {offsets = [0, 0, 0], sizes = [2, 16, 128], strides = [1, 1, 1]} : vector<2x24x128xf32> to vector<2x16x128xf32>
    %9 = tpu.iota {dimensions = array<i32: 0>} : vector<32x1xi32>
    %c16_i32 = arith.constant 16 : i32
    %c0_i32 = arith.constant 0 : i32
    %10 = arith.cmpi eq, %c16_i32, %c0_i32 : i32
    %c1_i32 = arith.constant 1 : i32
    %11 = arith.select %10, %c1_i32, %c16_i32 : i32
    %12 = vector.broadcast %11 : i32 to vector<32x1xi32>
    %13 = arith.remsi %9, %12 : vector<32x1xi32>
    %c0_i32_3 = arith.constant 0 : i32
    %14 = vector.broadcast %c0_i32_3 : i32 to vector<32x1xi32>
    %15 = arith.cmpi ne, %13, %14 : vector<32x1xi32>
    %c0_i32_4 = arith.constant 0 : i32
    %16 = vector.broadcast %c0_i32_4 : i32 to vector<32x1xi32>
    %17 = arith.cmpi slt, %13, %16 : vector<32x1xi32>
    %c0_i32_5 = arith.constant 0 : i32
    %18 = arith.cmpi slt, %11, %c0_i32_5 : i32
    %19 = vector.broadcast %18 : i1 to vector<32x1xi1>
    %20 = vector.broadcast %19 : vector<32x1xi1> to vector<32x1xi1>
    %21 = arith.xori %17, %20 : vector<32x1xi1>
    %22 = arith.andi %21, %15 : vector<32x1xi1>
    %23 = vector.broadcast %11 : i32 to vector<32x1xi32>
    %24 = arith.addi %13, %23 : vector<32x1xi32>
    %25 = arith.select %22, %24, %13 : vector<32x1xi1>, vector<32x1xi32>
    %c0_i32_6 = arith.constant 0 : i32
    %26 = vector.broadcast %c0_i32_6 : i32 to vector<32x1xi32>
    %27 = arith.cmpi sgt, %25, %26 : vector<32x1xi32>
    %28 = arith.extui %27 : vector<32x1xi1> to vector<32x1xi32>
    %29 = arith.sitofp %28 : vector<32x1xi32> to vector<32x1xf32>
    %c15_i32 = arith.constant 15 : i32
    %30 = vector.broadcast %c15_i32 : i32 to vector<32x1xi32>
    %31 = arith.cmpi slt, %25, %30 : vector<32x1xi32>
    %32 = arith.extui %31 : vector<32x1xi1> to vector<32x1xi32>
    %33 = arith.sitofp %32 : vector<32x1xi32> to vector<32x1xf32>
    %cst_7 = arith.constant dense<0.000000e+00> : vector<2x128xf32>
    %34 = vector.multi_reduction <add>, %8, %cst_7 [1] : vector<2x16x128xf32> to vector<2x128xf32>
    %35 = vector.shape_cast %34 : vector<2x128xf32> to vector<2x1x128xf32>
    %36 = arith.mulf %8, %8 : vector<2x16x128xf32>
    %cst_8 = arith.constant dense<0.000000e+00> : vector<2x128xf32>
    %37 = vector.multi_reduction <add>, %36, %cst_8 [1] : vector<2x16x128xf32> to vector<2x128xf32>
    %38 = vector.shape_cast %37 : vector<2x128xf32> to vector<2x1x128xf32>
    %cst_9 = arith.constant 6.250000e-02 : f32
    %39 = vector.broadcast %cst_9 : f32 to vector<2x1x128xf32>
    %40 = arith.mulf %35, %39 : vector<2x1x128xf32>
    %cst_10 = arith.constant 6.250000e-02 : f32
    %41 = vector.broadcast %cst_10 : f32 to vector<2x1x128xf32>
    %42 = arith.mulf %38, %41 : vector<2x1x128xf32>
    %43 = arith.mulf %40, %40 : vector<2x1x128xf32>
    %44 = arith.subf %42, %43 : vector<2x1x128xf32>
    %cst_11 = arith.constant 0.000000e+00 : f32
    %45 = vector.broadcast %cst_11 : f32 to vector<2x1x128xf32>
    %46 = arith.maximumf %44, %45 : vector<2x1x128xf32>
    %47 = vector.broadcast %40 : vector<2x1x128xf32> to vector<2x16x128xf32>
    %48 = arith.subf %8, %47 : vector<2x16x128xf32>
    %cst_12 = arith.constant 9.99999974E-6 : f32
    %49 = vector.broadcast %cst_12 : f32 to vector<2x1x128xf32>
    %50 = arith.addf %46, %49 : vector<2x1x128xf32>
    %51 = math.rsqrt %50 : vector<2x1x128xf32>
    %52 = vector.broadcast %51 : vector<2x1x128xf32> to vector<2x16x128xf32>
    %53 = arith.mulf %48, %52 : vector<2x16x128xf32>
    %c0_13 = arith.constant 0 : index
    %c0_14 = arith.constant 0 : index
    %c0_15 = arith.constant 0 : index
    %54 = vector.load %arg3[%c0_13, %c0_14, %c0_15] : memref<3x16x1xf32, #tpu.memory_space<vmem>>, vector<1x16x1xf32>
    %55 = vector.shape_cast %54 : vector<1x16x1xf32> to vector<16x1xf32>
    %56 = vector.shape_cast %55 : vector<16x1xf32> to vector<1x16x1xf32>
    %57 = vector.broadcast %56 : vector<1x16x1xf32> to vector<2x16x128xf32>
    %58 = arith.mulf %53, %57 : vector<2x16x128xf32>
    %c0_16 = arith.constant 0 : index
    %c0_17 = arith.constant 0 : index
    %c0_18 = arith.constant 0 : index
    %59 = vector.load %arg4[%c0_16, %c0_17, %c0_18] : memref<3x16x1xf32, #tpu.memory_space<vmem>>, vector<1x16x1xf32>
    %60 = vector.shape_cast %59 : vector<1x16x1xf32> to vector<16x1xf32>
    %61 = vector.shape_cast %60 : vector<16x1xf32> to vector<1x16x1xf32>
    %62 = vector.broadcast %61 : vector<1x16x1xf32> to vector<2x16x128xf32>
    %63 = arith.addf %58, %62 : vector<2x16x128xf32>
    %cst_19 = arith.constant 0.000000e+00 : f32
    %64 = vector.broadcast %cst_19 : f32 to vector<2x16x128xf32>
    %65 = arith.cmpf ogt, %63, %64 : vector<2x16x128xf32>
    %cst_20 = arith.constant 2.000000e-01 : f32
    %66 = vector.broadcast %cst_20 : f32 to vector<2x16x128xf32>
    %67 = arith.mulf %66, %63 : vector<2x16x128xf32>
    %68 = arith.select %65, %63, %67 : vector<2x16x128xi1>, vector<2x16x128xf32>
    %69 = vector.shape_cast %68 : vector<2x16x128xf32> to vector<32x128xf32>
    %70 = arith.truncf %69 : vector<32x128xf32> to vector<32x128xbf16>
    %c0_21 = arith.constant 0 : index
    %c0_22 = arith.constant 0 : index
    %c0_23 = arith.constant 0 : index
    %71 = vector.load %arg5[%c0_21, %c0_22, %c0_23] : memref<3x384x128xbf16, #tpu.memory_space<vmem>>, vector<1x384x128xbf16>
    %72 = vector.shape_cast %71 : vector<1x384x128xbf16> to vector<384x128xbf16>
    %cst_24 = arith.constant dense<0.000000e+00> : vector<32x384xf32>
    %73 = tpu.matmul %70, %72, %cst_24 {dimension_numbers = #tpu.dot_dimension_numbers<[1], [1], [0], [0], [0, 0, 1, 0], [], []>} : vector<32x128xbf16>, vector<384x128xbf16>, vector<32x384xf32> -> vector<32x384xf32>
    %74 = vector.extract_strided_slice %73 {offsets = [0, 128], sizes = [32, 128], strides = [1, 1]} : vector<32x384xf32> to vector<32x128xf32>
    %75 = vector.extract_strided_slice %73 {offsets = [0, 0], sizes = [32, 128], strides = [1, 1]} : vector<32x384xf32> to vector<32x128xf32>
    %c1_i32_25 = arith.constant 1 : i32
    %76 = tpu.dynamic_rotate %75 by %c1_i32_25 dim 0 : vector<32x128xf32>, i32 -> vector<32x128xf32>
    %77 = vector.broadcast %29 : vector<32x1xf32> to vector<32x128xf32>
    %78 = arith.mulf %77, %76 : vector<32x128xf32>
    %79 = arith.addf %74, %78 : vector<32x128xf32>
    %80 = vector.extract_strided_slice %73 {offsets = [0, 256], sizes = [32, 128], strides = [1, 1]} : vector<32x384xf32> to vector<32x128xf32>
    %c31_i32 = arith.constant 31 : i32
    %81 = tpu.dynamic_rotate %80 by %c31_i32 dim 0 : vector<32x128xf32>, i32 -> vector<32x128xf32>
    %82 = vector.broadcast %33 : vector<32x1xf32> to vector<32x128xf32>
    %83 = arith.mulf %82, %81 : vector<32x128xf32>
    %84 = arith.addf %79, %83 : vector<32x128xf32>
    %85 = vector.shape_cast %84 : vector<32x128xf32> to vector<2x16x128xf32>
    %cst_26 = arith.constant dense<0.000000e+00> : vector<2x128xf32>
    %86 = vector.multi_reduction <add>, %85, %cst_26 [1] : vector<2x16x128xf32> to vector<2x128xf32>
    %87 = vector.shape_cast %86 : vector<2x128xf32> to vector<2x1x128xf32>
    %88 = arith.mulf %85, %85 : vector<2x16x128xf32>
    %cst_27 = arith.constant dense<0.000000e+00> : vector<2x128xf32>
    %89 = vector.multi_reduction <add>, %88, %cst_27 [1] : vector<2x16x128xf32> to vector<2x128xf32>
    %90 = vector.shape_cast %89 : vector<2x128xf32> to vector<2x1x128xf32>
    %cst_28 = arith.constant 6.250000e-02 : f32
    %91 = vector.broadcast %cst_28 : f32 to vector<2x1x128xf32>
    %92 = arith.mulf %87, %91 : vector<2x1x128xf32>
    %cst_29 = arith.constant 6.250000e-02 : f32
    %93 = vector.broadcast %cst_29 : f32 to vector<2x1x128xf32>
    %94 = arith.mulf %90, %93 : vector<2x1x128xf32>
    %95 = arith.mulf %92, %92 : vector<2x1x128xf32>
    %96 = arith.subf %94, %95 : vector<2x1x128xf32>
    %cst_30 = arith.constant 0.000000e+00 : f32
    %97 = vector.broadcast %cst_30 : f32 to vector<2x1x128xf32>
    %98 = arith.maximumf %96, %97 : vector<2x1x128xf32>
    %99 = vector.broadcast %92 : vector<2x1x128xf32> to vector<2x16x128xf32>
    %100 = arith.subf %85, %99 : vector<2x16x128xf32>
    %cst_31 = arith.constant 9.99999974E-6 : f32
    %101 = vector.broadcast %cst_31 : f32 to vector<2x1x128xf32>
    %102 = arith.addf %98, %101 : vector<2x1x128xf32>
    %103 = math.rsqrt %102 : vector<2x1x128xf32>
    %104 = vector.broadcast %103 : vector<2x1x128xf32> to vector<2x16x128xf32>
    %105 = arith.mulf %100, %104 : vector<2x16x128xf32>
    %c1 = arith.constant 1 : index
    %c0_32 = arith.constant 0 : index
    %c0_33 = arith.constant 0 : index
    %106 = vector.load %arg3[%c1, %c0_32, %c0_33] : memref<3x16x1xf32, #tpu.memory_space<vmem>>, vector<1x16x1xf32>
    %107 = vector.shape_cast %106 : vector<1x16x1xf32> to vector<16x1xf32>
    %108 = vector.shape_cast %107 : vector<16x1xf32> to vector<1x16x1xf32>
    %109 = vector.broadcast %108 : vector<1x16x1xf32> to vector<2x16x128xf32>
    %110 = arith.mulf %105, %109 : vector<2x16x128xf32>
    %c1_34 = arith.constant 1 : index
    %c0_35 = arith.constant 0 : index
    %c0_36 = arith.constant 0 : index
    %111 = vector.load %arg4[%c1_34, %c0_35, %c0_36] : memref<3x16x1xf32, #tpu.memory_space<vmem>>, vector<1x16x1xf32>
    %112 = vector.shape_cast %111 : vector<1x16x1xf32> to vector<16x1xf32>
    %113 = vector.shape_cast %112 : vector<16x1xf32> to vector<1x16x1xf32>
    %114 = vector.broadcast %113 : vector<1x16x1xf32> to vector<2x16x128xf32>
    %115 = arith.addf %110, %114 : vector<2x16x128xf32>
    %cst_37 = arith.constant 0.000000e+00 : f32
    %116 = vector.broadcast %cst_37 : f32 to vector<2x16x128xf32>
    %117 = arith.cmpf ogt, %115, %116 : vector<2x16x128xf32>
    %cst_38 = arith.constant 2.000000e-01 : f32
    %118 = vector.broadcast %cst_38 : f32 to vector<2x16x128xf32>
    %119 = arith.mulf %118, %115 : vector<2x16x128xf32>
    %120 = arith.select %117, %115, %119 : vector<2x16x128xi1>, vector<2x16x128xf32>
    %121 = vector.shape_cast %120 : vector<2x16x128xf32> to vector<32x128xf32>
    %122 = arith.truncf %121 : vector<32x128xf32> to vector<32x128xbf16>
    %c1_39 = arith.constant 1 : index
    %c0_40 = arith.constant 0 : index
    %c0_41 = arith.constant 0 : index
    %123 = vector.load %arg5[%c1_39, %c0_40, %c0_41] : memref<3x384x128xbf16, #tpu.memory_space<vmem>>, vector<1x384x128xbf16>
    %124 = vector.shape_cast %123 : vector<1x384x128xbf16> to vector<384x128xbf16>
    %cst_42 = arith.constant dense<0.000000e+00> : vector<32x384xf32>
    %125 = tpu.matmul %122, %124, %cst_42 {dimension_numbers = #tpu.dot_dimension_numbers<[1], [1], [0], [0], [0, 0, 1, 0], [], []>} : vector<32x128xbf16>, vector<384x128xbf16>, vector<32x384xf32> -> vector<32x384xf32>
    %126 = vector.extract_strided_slice %125 {offsets = [0, 128], sizes = [32, 128], strides = [1, 1]} : vector<32x384xf32> to vector<32x128xf32>
    %127 = vector.extract_strided_slice %125 {offsets = [0, 0], sizes = [32, 128], strides = [1, 1]} : vector<32x384xf32> to vector<32x128xf32>
    %c1_i32_43 = arith.constant 1 : i32
    %128 = tpu.dynamic_rotate %127 by %c1_i32_43 dim 0 : vector<32x128xf32>, i32 -> vector<32x128xf32>
    %129 = vector.broadcast %29 : vector<32x1xf32> to vector<32x128xf32>
    %130 = arith.mulf %129, %128 : vector<32x128xf32>
    %131 = arith.addf %126, %130 : vector<32x128xf32>
    %132 = vector.extract_strided_slice %125 {offsets = [0, 256], sizes = [32, 128], strides = [1, 1]} : vector<32x384xf32> to vector<32x128xf32>
    %c31_i32_44 = arith.constant 31 : i32
    %133 = tpu.dynamic_rotate %132 by %c31_i32_44 dim 0 : vector<32x128xf32>, i32 -> vector<32x128xf32>
    %134 = vector.broadcast %33 : vector<32x1xf32> to vector<32x128xf32>
    %135 = arith.mulf %134, %133 : vector<32x128xf32>
    %136 = arith.addf %131, %135 : vector<32x128xf32>
    %137 = vector.shape_cast %136 : vector<32x128xf32> to vector<2x16x128xf32>
    %cst_45 = arith.constant dense<0.000000e+00> : vector<2x128xf32>
    %138 = vector.multi_reduction <add>, %137, %cst_45 [1] : vector<2x16x128xf32> to vector<2x128xf32>
    %139 = vector.shape_cast %138 : vector<2x128xf32> to vector<2x1x128xf32>
    %140 = arith.mulf %137, %137 : vector<2x16x128xf32>
    %cst_46 = arith.constant dense<0.000000e+00> : vector<2x128xf32>
    %141 = vector.multi_reduction <add>, %140, %cst_46 [1] : vector<2x16x128xf32> to vector<2x128xf32>
    %142 = vector.shape_cast %141 : vector<2x128xf32> to vector<2x1x128xf32>
    %cst_47 = arith.constant 6.250000e-02 : f32
    %143 = vector.broadcast %cst_47 : f32 to vector<2x1x128xf32>
    %144 = arith.mulf %139, %143 : vector<2x1x128xf32>
    %cst_48 = arith.constant 6.250000e-02 : f32
    %145 = vector.broadcast %cst_48 : f32 to vector<2x1x128xf32>
    %146 = arith.mulf %142, %145 : vector<2x1x128xf32>
    %147 = arith.mulf %144, %144 : vector<2x1x128xf32>
    %148 = arith.subf %146, %147 : vector<2x1x128xf32>
    %cst_49 = arith.constant 0.000000e+00 : f32
    %149 = vector.broadcast %cst_49 : f32 to vector<2x1x128xf32>
    %150 = arith.maximumf %148, %149 : vector<2x1x128xf32>
    %151 = vector.broadcast %144 : vector<2x1x128xf32> to vector<2x16x128xf32>
    %152 = arith.subf %137, %151 : vector<2x16x128xf32>
    %cst_50 = arith.constant 9.99999974E-6 : f32
    %153 = vector.broadcast %cst_50 : f32 to vector<2x1x128xf32>
    %154 = arith.addf %150, %153 : vector<2x1x128xf32>
    %155 = math.rsqrt %154 : vector<2x1x128xf32>
    %156 = vector.broadcast %155 : vector<2x1x128xf32> to vector<2x16x128xf32>
    %157 = arith.mulf %152, %156 : vector<2x16x128xf32>
    %c2 = arith.constant 2 : index
    %c0_51 = arith.constant 0 : index
    %c0_52 = arith.constant 0 : index
    %158 = vector.load %arg3[%c2, %c0_51, %c0_52] : memref<3x16x1xf32, #tpu.memory_space<vmem>>, vector<1x16x1xf32>
    %159 = vector.shape_cast %158 : vector<1x16x1xf32> to vector<16x1xf32>
    %160 = vector.shape_cast %159 : vector<16x1xf32> to vector<1x16x1xf32>
    %161 = vector.broadcast %160 : vector<1x16x1xf32> to vector<2x16x128xf32>
    %162 = arith.mulf %157, %161 : vector<2x16x128xf32>
    %c2_53 = arith.constant 2 : index
    %c0_54 = arith.constant 0 : index
    %c0_55 = arith.constant 0 : index
    %163 = vector.load %arg4[%c2_53, %c0_54, %c0_55] : memref<3x16x1xf32, #tpu.memory_space<vmem>>, vector<1x16x1xf32>
    %164 = vector.shape_cast %163 : vector<1x16x1xf32> to vector<16x1xf32>
    %165 = vector.shape_cast %164 : vector<16x1xf32> to vector<1x16x1xf32>
    %166 = vector.broadcast %165 : vector<1x16x1xf32> to vector<2x16x128xf32>
    %167 = arith.addf %162, %166 : vector<2x16x128xf32>
    %cst_56 = arith.constant 0.000000e+00 : f32
    %168 = vector.broadcast %cst_56 : f32 to vector<2x16x128xf32>
    %169 = arith.cmpf ogt, %167, %168 : vector<2x16x128xf32>
    %cst_57 = arith.constant 2.000000e-01 : f32
    %170 = vector.broadcast %cst_57 : f32 to vector<2x16x128xf32>
    %171 = arith.mulf %170, %167 : vector<2x16x128xf32>
    %172 = arith.select %169, %167, %171 : vector<2x16x128xi1>, vector<2x16x128xf32>
    %173 = vector.shape_cast %172 : vector<2x16x128xf32> to vector<32x128xf32>
    %174 = arith.truncf %173 : vector<32x128xf32> to vector<32x128xbf16>
    %c2_58 = arith.constant 2 : index
    %c0_59 = arith.constant 0 : index
    %c0_60 = arith.constant 0 : index
    %175 = vector.load %arg5[%c2_58, %c0_59, %c0_60] : memref<3x384x128xbf16, #tpu.memory_space<vmem>>, vector<1x384x128xbf16>
    %176 = vector.shape_cast %175 : vector<1x384x128xbf16> to vector<384x128xbf16>
    %cst_61 = arith.constant dense<0.000000e+00> : vector<32x384xf32>
    %177 = tpu.matmul %174, %176, %cst_61 {dimension_numbers = #tpu.dot_dimension_numbers<[1], [1], [0], [0], [0, 0, 1, 0], [], []>} : vector<32x128xbf16>, vector<384x128xbf16>, vector<32x384xf32> -> vector<32x384xf32>
    %178 = vector.extract_strided_slice %177 {offsets = [0, 128], sizes = [32, 128], strides = [1, 1]} : vector<32x384xf32> to vector<32x128xf32>
    %179 = vector.extract_strided_slice %177 {offsets = [0, 0], sizes = [32, 128], strides = [1, 1]} : vector<32x384xf32> to vector<32x128xf32>
    %c1_i32_62 = arith.constant 1 : i32
    %180 = tpu.dynamic_rotate %179 by %c1_i32_62 dim 0 : vector<32x128xf32>, i32 -> vector<32x128xf32>
    %181 = vector.broadcast %29 : vector<32x1xf32> to vector<32x128xf32>
    %182 = arith.mulf %181, %180 : vector<32x128xf32>
    %183 = arith.addf %178, %182 : vector<32x128xf32>
    %184 = vector.extract_strided_slice %177 {offsets = [0, 256], sizes = [32, 128], strides = [1, 1]} : vector<32x384xf32> to vector<32x128xf32>
    %c31_i32_63 = arith.constant 31 : i32
    %185 = tpu.dynamic_rotate %184 by %c31_i32_63 dim 0 : vector<32x128xf32>, i32 -> vector<32x128xf32>
    %186 = vector.broadcast %33 : vector<32x1xf32> to vector<32x128xf32>
    %187 = arith.mulf %186, %185 : vector<32x128xf32>
    %188 = arith.addf %183, %187 : vector<32x128xf32>
    %189 = vector.shape_cast %188 : vector<32x128xf32> to vector<2x16x128xf32>
    %c0_64 = arith.constant 0 : index
    %c0_65 = arith.constant 0 : index
    %c0_66 = arith.constant 0 : index
    %190 = vector.load %arg6[%c0_64, %c0_65, %c0_66] : memref<2x16x128xf32, #tpu.memory_space<vmem>>, vector<2x16x128xf32>
    tpu.vector_store %arg6[%c0_64, %c0_65, %c0_66], %189 {strides = array<i32>} : memref<2x16x128xf32, #tpu.memory_space<vmem>>, vector<2x16x128xf32>,
    return
  }
  func.func @transform_0(%arg0: i32) -> (i32, i32) {
    %c0_i32 = arith.constant 0 : i32
    %c0_i32_0 = arith.constant 0 : i32
    return %arg0, %c0_i32 : i32, i32
  }
  func.func @transform_1(%arg0: i32) -> (i32, i32) {
    %c0_i32 = arith.constant 0 : i32
    %c0_i32_0 = arith.constant 0 : i32
    %c0_i32_1 = arith.constant 0 : i32
    return %c0_i32, %c0_i32_0 : i32, i32
  }
  func.func @transform_2(%arg0: i32) -> (i32, i32, i32) {
    %c0_i32 = arith.constant 0 : i32
    %c0_i32_0 = arith.constant 0 : i32
    %c0_i32_1 = arith.constant 0 : i32
    %c0_i32_2 = arith.constant 0 : i32
    return %c0_i32, %c0_i32_0, %c0_i32_1 : i32, i32, i32
  }
  func.func @transform_3(%arg0: i32) -> (i32, i32, i32) {
    %c0_i32 = arith.constant 0 : i32
    %c0_i32_0 = arith.constant 0 : i32
    %c0_i32_1 = arith.constant 0 : i32
    %c0_i32_2 = arith.constant 0 : i32
    return %c0_i32, %c0_i32_0, %c0_i32_1 : i32, i32, i32
  }
  func.func @transform_4(%arg0: i32) -> (i32, i32, i32) {
    %c0_i32 = arith.constant 0 : i32
    %c0_i32_0 = arith.constant 0 : i32
    %c0_i32_1 = arith.constant 0 : i32
    %c0_i32_2 = arith.constant 0 : i32
    return %c0_i32, %c0_i32_0, %c0_i32_1 : i32, i32, i32
  }
  func.func @transform_5(%arg0: i32) -> (i32, i32, i32) {
    %c0_i32 = arith.constant 0 : i32
    %c0_i32_0 = arith.constant 0 : i32
    %c0_i32_1 = arith.constant 0 : i32
    return %arg0, %c0_i32, %c0_i32_0 : i32, i32, i32
  }
}

</mosaic_0001>

<bundles_post_ra>
// kernel: _lambda_.1
= control target key start
LH: loop header
LB: loop body
LE: loop exit
PB: predicated region body
PF: predicated region fallthrough
CT: control target
= control target key end

     0   :  { %10 = vsyncpa [#allocation3], 0  ;;  %s3167_s0 = inlined_call_operand.vmem [shape: bf16[96,32], index: 0, kind: input, shape index: {}]   ;;  %s3168_s1 = inlined_call_operand.vmem [shape: bf16[256,32], index: 1, kind: input, shape index: {}]   ;;  %s3169_s2 = inlined_call_operand.vmem [shape: f32[3,16,1], index: 2, kind: input, shape index: {}]   ;;  %s3170_s3 = inlined_call_operand.vmem [shape: f32[3,16,1], index: 3, kind: input, shape index: {}]   ;;  %s3171_s4 = inlined_call_operand.vmem [shape: bf16[3,384,128], index: 4, kind: input, shape index: {}]   ;;  %s3172_s5 = inlined_call_operand.hbm [shape: f32[4,16,128], index: 5, kind: output, shape index: {}]  }
   0x1   :  { %12 = vsyncpa [#allocation3 + $0x1], 0  ;;  %s2589_s18 = smov 0   ;;  %s2591_s19 = smov 0  }
   0x2   :  { %s2593_s20 = smov 0   ;;  %s2595_s21 = smov 0  }
   0x3 LB: > { %s2610_s22 = sadd.s32 4294967295, %s2553_s21   ;;  %s1842_s23 = sadd.s32 4294967294, %s2553_s21   ;;  %s2553_s21 = sphi %s2595_s21, %s3178_s21   ;;  %s2549_s20 = sphi %s2593_s20, %s3177_s20   ;;  %s2545_s19 = sphi %s2591_s19, %s3176_s19   ;;  %s2541_s18 = sphi %s2589_s18, %s3175_s18  }
   0x4   : > { %s2614_s24 = sadd.s32 1, %s2553_s21   ;;  %s135_s25 = sadd.s32 1, %s2549_s20 }
   0x5   : > { %s132_s26 = ssub.s32 %s2553_s21, %s2614_s24  ;;  %p145_p0 = scmp.ne.s32.totalorder %s2549_s20, %s2545_s19 }
   0x6   : > { %p133_p1 = scmp.eq.s32.totalorder %s132_s26, 0  ;;  %p146_p2 = scmp.eq.s32.totalorder %s2610_s22, 1 }
   0x7   : > { %p151_p3 = scmp.ne.s32.totalorder %s2545_s19, %s2541_s18  ;;  %p152_p4 = scmp.eq.s32.totalorder %s1842_s23, 1 }
   0x8   : > { %s2625_s27 = scalar_select %p133_p1, %s2549_s20, %s135_s25  }
   0x9   : > { %p2627_p5 = por %p146_p2, %p145_p0  ;;  %p2631_p6 = por %p152_p4, %p151_p3 }
   0xa   : > { %p1845_p7 = scmp.ge.s32.totalorder %s2553_s21, 1  ;;  %p191_p8 = scmp.lt.s32.totalorder %s2553_s21, 3 }
   0xc   : > { %p192_p9 = pnand %p1845_p7, %p191_p8 }
   0xd   : > { %s219_s17 = smul.u32 (!%p192_p9), 6, %s2610_s22  ;;  %s216_s23 = sand.u32 (!%p192_p9), 1, %s2545_s19  }
   0xe   : > { %195 = sbr.rel (%p192_p9) target bundleno = 890 (0x37a), region = 40  ;;  %s1846_s25 = sshll.u32 (!%p192_p9), %s216_s23, 5 }
   0xf   : > { %p220_p10 = scmp.lt.s32.totalorder (!%p192_p9), %s219_s17, 11  ;;  %s2424_s26 = sshll.u32 (!%p192_p9), %s2610_s22, 5 }
  0x10   : > { %s218_s30 = scalar_lea.vmem (!%p192_p9), [#allocation2], %s1846_s25  ;;  %s1776_s8 = scalar_lea.hbm (!%p192_p9), %s3172_s5, %s2424_s26 }
  0x11   : > { %s1777_s10 = sshll.u32 (!%p192_p9), %s218_s30, 4  ;;  %s1779_s11 = sshll.u32 (!%p192_p9), %s1776_s8, 4  ;;  %s1778_s10 = int_to_ptr.vmem [resolvable:$true] %s1777_s10  ;;  %s1780_s11 = int_to_ptr.hbm [resolvable:$true] %s1779_s11 }
  0x12   : > { %s1764_s22 = scalar_lea.sflag (!%p192_p9), [#allocation3], %s216_s23  ;;  %s2505_s12 = sshra.s32 (!%p192_p9), %s1780_s11, 4  ;;  %s2506_s12 = int_to_ptr.hbm [resolvable:$true] %s2505_s12 }
  0x13   : > { %v2350_v0 = vld [vmem:[%s3168_s1 + $0x78] sm:$0xff]  ;;  %vm359_vm0 = vcmask 261120   ;;  %v2349_v4 = vld [vmem:[%s3168_s1 + $0x70] sm:$0xff]  ;;  %v2348_v8 = vld [vmem:[%s3168_s1 + $0x68] sm:$0xff]  ;;  %s3180_s17 = smov (!%p220_p10, %s219_s17), 11  ;;  %v2555_v35 = vmov 0   ;;  %v469_v58 = vlaneseq  ;;  %p2512_p0 = scmp.lt.s32.totalorder %s2506_s12, %s3172_s5 }
  0x14   : > { %v2342_v1 = vld [vmem:[%s3168_s1 + $0x38] sm:$0xff]  ;;  %v415_v2 = vsel %vm359_vm0, %v2350_v0, 0  ;;  %v2341_v5 = vld [vmem:[%s3168_s1 + $0x30] sm:$0xff]  ;;  %v412_v6 = vsel %vm359_vm0, %v2349_v4, 0  ;;  %v2340_v9 = vld [vmem:[%s3168_s1 + $0x28] sm:$0xff]  ;;  %v409_v10 = vsel %vm359_vm0, %v2348_v8, 0  ;;  %2476 = vset.pattern.permute.xlu0 %v2555_v35  ;;  %2477 = vset.pattern.permute.xlu1 %v2555_v35 }
  0x15   : > { %v391_v3 = vsel %vm359_vm0, %v2342_v1, 0  ;;  %439 = vmatpush.bf16.xpose.msra.mxu1 %v415_v2  ;;  %v388_v7 = vsel %vm359_vm0, %v2341_v5, 0  ;;  %v385_v11 = vsel %vm359_vm0, %v2340_v9, 0  ;;  %v2347_v12 = vld [vmem:[%s3168_s1 + $0x60] sm:$0xff]  ;;  %v2346_v16 = vld [vmem:[%s3168_s1 + $0x58] sm:$0xff]  ;;  %v2345_v20 = vld [vmem:[%s3168_s1 + $0x50] sm:$0xff]  ;;  %2478 = vset.pattern.permute.xlu2 %v2555_v35 }
  0x16   : > { %417 = vmatpush.bf16.xpose.msra.mxu0 %v391_v3  ;;  %v2339_v13 = vld [vmem:[%s3168_s1 + $0x20] sm:$0xff]  ;;  %v406_v14 = vsel %vm359_vm0, %v2347_v12, 0  ;;  %v2338_v17 = vld [vmem:[%s3168_s1 + $0x18] sm:$0xff]  ;;  %v403_v18 = vsel %vm359_vm0, %v2346_v16, 0  ;;  %v2337_v21 = vld [vmem:[%s3168_s1 + $0x10] sm:$0xff]  ;;  %v400_v22 = vsel %vm359_vm0, %v2345_v20, 0 }
  0x17   : > { %v382_v15 = vsel %vm359_vm0, %v2339_v13, 0  ;;  %v379_v19 = vsel %vm359_vm0, %v2338_v17, 0  ;;  %v376_v23 = vsel %vm359_vm0, %v2337_v21, 0  ;;  %v2344_v24 = vld [vmem:[%s3168_s1 + $0x48] sm:$0xff]  ;;  %v2343_v28 = vld [vmem:[%s3168_s1 + $0x40] sm:$0xff]  ;;  %s1847_s6 = sshll.u32 %s3180_s17, 2 }
  0x18   : > { %v2336_v25 = vld [vmem:[%s3168_s1 + $0x8] sm:$0xff]  ;;  %v397_v26 = vsel %vm359_vm0, %v2344_v24, 0  ;;  %v2335_v29 = vld [vmem:[%s3168_s1] sm:$0xff]  ;;  %v394_v30 = vsel %vm359_vm0, %v2343_v28, 0  ;;  %s223_s9 = scalar_lea.vmem %s3167_s0, %s1847_s6  ;;  %v2032_v39 = vld [vmem:[%s3170_s3 + $0x10] sm:$0xff]  ;;  %v2771_v60 = vshrl.u32 %v469_v58, 7 }
  0x19   : > { %v373_v27 = vsel %vm359_vm0, %v2336_v25, 0  ;;  %v370_v31 = vsel %vm359_vm0, %v2335_v29, 0  ;;  %v2332_v32 = vld [vmem:[%s223_s9] sm:$0xff]  ;;  %v628_v36 = vld [vmem:[%s3169_s2 + $0x8] sm:$0xff]  ;;  %v2033_v40 = vld [vmem:[%s3170_s3 + $0x18] sm:$0xff]  ;;  %s2507_s13 = scalar_lea.hbm %s2506_s12, 32 }
  0x1a   : > { %v627_v33 = vld [vmem:[%s3169_s2] sm:$0xff]  ;;  %v644_v37 = vld [vmem:[%s3170_s3 + $0x8] sm:$0xff]  ;;  %v2334_v43 = vld [vmem:[%s223_s9 + $0x10] sm:$0xff]  ;;  %vm471_vm1 = vcmp.lt.s32.totalorder %v2771_v60, 7  ;;  %vm926_vm13 = vcmp.lt.s32.totalorder %v2771_v60, 1  ;;  %p2508_p11 = scmp.ne.s32.totalorder %s2506_s12, %s2507_s13  ;;  %s2511_s16 = scalar_lea.hbm %s3172_s5, 64 }
  0x1b   : > { %v643_v34 = vld [vmem:[%s3170_s3] sm:$0xff]  ;;  %631 = vperm.xlu0 %2476, %v627_v33   ;;  %v2333_v38 = vld [vmem:[%s223_s9 + $0x8] sm:$0xff]  ;;  %v2358_v44 = vld [vmem:[%s3171_s4 + $0x38] sm:$0xff]  ;;  %p2513_p1 = scmp.lt.s32.totalorder %s2511_s16, %s2507_s13 }
  0x1c   : > { %647 = vperm.xlu1 %2477, %v643_v34   ;;  %v2179_v41 = vld [vmem:[%s3169_s2 + $0x28] sm:$0xff]  ;;  %v2180_v42 = vld [vmem:[%s3170_s3 + $0x20] sm:$0xff]  ;;  %v2366_v45 = vld [vmem:[%s3171_s4 + $0x78] sm:$0xff]  ;;  %865 = vmatpush.bf16.xpose.msra.mxu2 %v2358_v44  ;;  %p2509_p12 = pnand %p2508_p11, %p2627_p5 }
  0x1d   : > { %440 = vmatpush.bf16.xpose.msra.mxu1 %v412_v6  ;;  %v2374_v46 = vld [vmem:[%s3171_s4 + $0xb8] sm:$0xff]  ;;  %884 = vmatpush.bf16.xpose.msra.mxu3 %v2366_v45  ;;  %v2357_v47 = vld [vmem:[%s3171_s4 + $0x30] sm:$0xff]  ;;  %v2356_v50 = vld [vmem:[%s3171_s4 + $0x28] sm:$0xff]  ;;  %p2514_p2 = por %p2513_p1, %p2512_p0 }
  0x1e   : > { %418 = vmatpush.bf16.xpose.msra.mxu0 %v388_v7  ;;  %v2365_v48 = vld [vmem:[%s3171_s4 + $0x70] sm:$0xff]  ;;  %v2364_v51 = vld [vmem:[%s3171_s4 + $0x68] sm:$0xff]  ;;  %v2355_v55 = vld [vmem:[%s3171_s4 + $0x20] sm:$0xff]  ;;  %p2510_p13 = pneg %p2509_p12 }
  0x1f   : > { %v2373_v49 = vld [vmem:[%s3171_s4 + $0xb0] sm:$0xff]  ;;  %v2372_v52 = vld [vmem:[%s3171_s4 + $0xa8] sm:$0xff]  ;;  %v2363_v56 = vld [vmem:[%s3171_s4 + $0x60] sm:$0xff] }
  0x20   : > { %v2371_v57 = vld [vmem:[%s3171_s4 + $0xa0] sm:$0xff]  ;;  %v2354_v62 = vld [vmem:[%s3171_s4 + $0x18] sm:$0xff]  ;;  %v2353_v9 = vld [vmem:[%s3171_s4 + $0x10] sm:$0xff]  ;;  %p2515_p3 = pnand %p2514_p2, %p2510_p13 }
  0x21   : > { %v2362_v63 = vld [vmem:[%s3171_s4 + $0x58] sm:$0xff]  ;;  %v2368_v24 = vld [vmem:[%s3171_s4 + $0x88] sm:$0xff] }
  0x22   : > { %v2370_v0 = vld [vmem:[%s3171_s4 + $0x98] sm:$0xff] }
  0x23   : > { %636 = vperm.xlu0 %2476, %v628_v36   ;;  %v2351_v36 = vld [vmem:[%s3171_s4] sm:$0xff] }
  0x24   : > { %652 = vperm.xlu1 %2477, %v644_v37   ;;  %866 = vmatpush.bf16.xpose.msra.mxu2 %v2357_v47  ;;  %v2359_v37 = vld [vmem:[%s3171_s4 + $0x40] sm:$0xff] }
  0x25   : > { %441 = vmatpush.bf16.xpose.msra.mxu1 %v409_v10  ;;  %885 = vmatpush.bf16.xpose.msra.mxu3 %v2365_v48  ;;  %v2361_v10 = vld [vmem:[%s3171_s4 + $0x50] sm:$0xff] }
  0x26   : > { %419 = vmatpush.bf16.xpose.msra.mxu0 %v385_v11  ;;  %v2369_v11 = vld [vmem:[%s3171_s4 + $0x90] sm:$0xff] }
  0x2b   : > { %1049 = vperm.xlu0 %2476, %v2032_v39  }
  0x2c   : > { %1054 = vperm.xlu1 %2477, %v2033_v40   ;;  %867 = vmatpush.bf16.xpose.msra.mxu2 %v2356_v50 }
  0x2d   : > { %442 = vmatpush.bf16.xpose.msra.mxu1 %v406_v14  ;;  %886 = vmatpush.bf16.xpose.msra.mxu3 %v2364_v51 }
  0x2e   : > { %420 = vmatpush.bf16.xpose.msra.mxu0 %v382_v15 }
  0x33   : > { %1439 = vperm.xlu0 %2476, %v2179_v41  }
  0x34   : > { %1451 = vperm.xlu1 %2477, %v2180_v42   ;;  %868 = vmatpush.bf16.xpose.msra.mxu2 %v2355_v55 }
  0x35   : > { %443 = vmatpush.bf16.xpose.msra.mxu1 %v403_v18  ;;  %887 = vmatpush.bf16.xpose.msra.mxu3 %v2363_v56 }
  0x36   : > { %421 = vmatpush.bf16.xpose.msra.mxu0 %v379_v19 }
  0x3c   : > { %869 = vmatpush.bf16.xpose.msra.mxu2 %v2354_v62 }
  0x3d   : > { %444 = vmatpush.bf16.xpose.msra.mxu1 %v400_v22  ;;  %888 = vmatpush.bf16.xpose.msra.mxu3 %v2362_v63  ;;  %v2352_v22 = vld [vmem:[%s3171_s4 + $0x8] sm:$0xff] }
  0x3e   : > { %422 = vmatpush.bf16.xpose.msra.mxu0 %v376_v23  ;;  %v2360_v23 = vld [vmem:[%s3171_s4 + $0x48] sm:$0xff] }
  0x44   : > { %870 = vmatpush.bf16.xpose.msra.mxu2 %v2353_v9 }
  0x45   : > { %445 = vmatpush.bf16.xpose.msra.mxu1 %v397_v26  ;;  %889 = vmatpush.bf16.xpose.msra.mxu3 %v2361_v10 }
  0x46   : > { %423 = vmatpush.bf16.xpose.msra.mxu0 %v373_v27 }
  0x4c   : > { %871 = vmatpush.bf16.xpose.msra.mxu2 %v2352_v22 }
  0x4d   : > { %446 = vmatpush.bf16.xpose.msra.mxu1 %v394_v30  ;;  %890 = vmatpush.bf16.xpose.msra.mxu3 %v2360_v23 }
  0x4e   : > { %424 = vmatpush.bf16.xpose.msra.mxu0 %v370_v31 }
  0x54   : > { %1927 = vmatmul.msk.bf16.vlgmr.msra.gmra.mxu1 %vm359_vm0, %v2332_v32  ;;  %872 = vmatpush.bf16.xpose.msra.mxu2 %v2351_v36 }
  0x55   : > { %1924 = vmatmul.msk.bf16.vlgmr.msra.gmra.mxu0 %vm359_vm0, %v2332_v32  ;;  %891 = vmatpush.bf16.xpose.msra.mxu3 %v2359_v37 }
  0x56   : > { %903 = vmatpush.bf16.xpose.msrb.mxu0 %v2374_v46 }
  0x5e   : > { %904 = vmatpush.bf16.xpose.msrb.mxu0 %v2373_v49 }
  0x64   : > { %1928 = vmatmul.msk.bf16.gmra.mxu1 %vm359_vm0, %v2333_v38 }
  0x65   : > { %1925 = vmatmul.msk.bf16.gmra.mxu0 %vm359_vm0, %v2333_v38  ;;  %v2367_v38 = vld [vmem:[%s3171_s4 + $0x80] sm:$0xff] }
  0x66   : > { %905 = vmatpush.bf16.xpose.msrb.mxu0 %v2372_v52 }
  0x6e   : > { %906 = vmatpush.bf16.xpose.msrb.mxu0 %v2371_v57 }
  0x74   : > { %1929 = vmatmul.msk.bf16.gmra.mxu1 %vm359_vm0, %v2334_v43 }
  0x75   : > { %1926 = vmatmul.msk.bf16.gmra.mxu0 %vm359_vm0, %v2334_v43 }
  0x76   : > { %907 = vmatpush.bf16.xpose.msrb.mxu0 %v2370_v0 }
  0x7e   : > { %908 = vmatpush.bf16.xpose.msrb.mxu0 %v2369_v11 }
  0x86   : > { %909 = vmatpush.bf16.xpose.msrb.mxu0 %v2368_v24 }
  0x8e   : > { %910 = vmatpush.bf16.xpose.msrb.mxu0 %v2367_v38  ;;  %v648_v10 = vpop.permute.xlu1 %647  ;;  %v2031_v38 = vld [vmem:[%s3169_s2 + $0x18] sm:$0xff] }
  0xd1   : > { %v448_v53 = vpop.f32.mrf.mxu1 }
  0xd2   : > { %v426_v54 = vpop.f32.mrf.mxu0  ;;  %v463_v2 = vrot.slane %v448_v53, 1 }
  0xd9   : > { %v450_v59 = vpop.f32.mrf.mxu1 }
  0xda   : > { %v428_v61 = vpop.f32.mrf.mxu0  ;;  %v464_v1 = vrot.slane %v450_v59, 1 }
  0xdc   : > { %v475_v3 = vsel %vm471_vm1, %v463_v2, %v464_v1 }
  0xdd   : > { %v2785_v7 = vadd.f32 %v475_v3, %v426_v54 }
  0xdf   : > { %v569_v13 = vmul.f32 %v2785_v7, %v2785_v7 }
  0xe1   : > { %v453_v4 = vpop.f32.mrf.mxu1 }
  0xe2   : > { %v431_v5 = vpop.f32.mrf.mxu0  ;;  %v465_v6 = vrot.slane %v453_v4, 1  ;;  %v632_v4 = vpop.permute.xlu0 %631 }
  0xe4   : > { %v474_v8 = vsel %vm471_vm1, %v464_v1, %v465_v6 }
  0xe5   : > { %v2798_v12 = vadd.f32 %v474_v8, %v428_v61 }
  0xe7   : > { %v555_v14 = vadd.f32 %v2798_v12, %v2785_v7  ;;  %v570_v15 = vmul.f32 %v2798_v12, %v2798_v12 }
  0xe9   : > { %v556_v16 = vrot.slane %v555_v14, 4  ;;  %v573_v17 = vadd.f32 %v570_v15, %v569_v13  ;;  %v455_v18 = vpop.f32.mrf.mxu1 }
  0xea   : > { %v432_v19 = vpop.f32.mrf.mxu0  ;;  %v466_v41 = vrot.slane %v455_v18, 1 }
  0xeb   : > { %v557_v20 = vadd.f32 %v556_v16, %v555_v14  ;;  %v574_v21 = vrot.slane %v573_v17, 4 }
  0xed   : > { %v558_v25 = vrot.slane %v557_v20, 2  ;;  %v575_v26 = vadd.f32 %v574_v21, %v573_v17 }
  0xef   : > { %v576_v27 = vrot.slane %v575_v26, 2  ;;  %v559_v28 = vadd.f32 %v558_v25, %v557_v20 }
  0xf1   : > { %v577_v29 = vadd.f32 %v576_v27, %v575_v26  ;;  %v458_v30 = vpop.f32.mrf.mxu1  ;;  %v560_v32 = vrot.slane %v559_v28, 1  ;;  %v637_v26 = vpop.permute.xlu0 %636 }
  0xf2   : > { %v435_v31 = vpop.f32.mrf.mxu0  ;;  %v467_v35 = vrot.slane %v458_v30, 1  ;;  %v653_v30 = vpop.permute.xlu1 %652 }
  0xf3   : > { %v561_v33 = vadd.f32 %v560_v32, %v559_v28  ;;  %v578_v34 = vrot.slane %v577_v29, 1 }
  0xf4   : > { %v473_v44 = vsel %vm471_vm1, %v466_v41, %v467_v35 }
  0xf5   : > { %v579_v39 = vadd.f32 %v578_v34, %v577_v29  ;;  %v587_v40 = vmul.f32 0.0625, %v561_v33  ;;  %v2826_v49 = vadd.f32 %v473_v44, %v432_v19  ;;  %v2030_v34 = vld [vmem:[%s3169_s2 + $0x10] sm:$0xff] }
  0xf6   : > { %1032 = vperm.xlu2 %2478, %v2030_v34  }
  0xf7   : > { %v589_v42 = vmul.f32 0.0625, %v579_v39  ;;  %v591_v43 = vmul.f32 %v587_v40, %v587_v40  ;;  %v571_v54 = vmul.f32 %v2826_v49, %v2826_v49  ;;  %v597_v20 = vsub.f32 %v2785_v7, %v587_v40 }
  0xf8   : > { %v598_v21 = vsub.f32 %v2798_v12, %v587_v40 }
  0xf9   : > { %v460_v45 = vpop.f32.mrf.mxu1  ;;  %v593_v46 = vsub.f32 %v589_v42, %v591_v43  ;;  %v2178_v43 = vld [vmem:[%s3169_s2 + $0x20] sm:$0xff] }
  0xfa   : > { %v437_v47 = vpop.f32.mrf.mxu0  ;;  %v468_v48 = vrot.slane %v460_v45, 1 }
  0xfb   : > { %v595_v50 = vmax.f32 %v593_v46, 0.0 }
  0xfc   : > { %v472_v51 = vsel %vm471_vm1, %v467_v35, %v468_v48 }
  0xfd   : > { %v2830_v52 = vadd.f32 %v472_v51, %v435_v31  ;;  %v601_v53 = vadd.f32 1e-05, %v595_v50 }
  0xfe   : > { %1037 = vperm.xlu2 %2478, %v2031_v38  }
  0xff   : > { %v562_v55 = vadd.f32 %v2830_v52, %v2826_v49  ;;  %v572_v56 = vmul.f32 %v2830_v52, %v2830_v52  ;;  %2479 = vrsqrt.f32 %v601_v53  ;;  %vm609_vm3 = vweird.f32 %v601_v53 }
 0x101   : > { %v563_v57 = vrot.slane %v562_v55, 4  ;;  %v580_v58 = vadd.f32 %v572_v56, %v571_v54 }
 0x103   : > { %v564_v59 = vadd.f32 %v563_v57, %v562_v55  ;;  %v581_v61 = vrot.slane %v580_v58, 4  ;;  %v2181_v55 = vld [vmem:[%s3170_s3 + $0x28] sm:$0xff] }
 0x105   : > { %v2480_v62 = vpop.eup %2479  ;;  %v565_v63 = vrot.slane %v564_v59, 2  ;;  %v582_v0 = vadd.f32 %v581_v61, %v580_v58 }
 0x106   : > { %v604_v1 = vmul.f32 %v2480_v62, %v601_v53  ;;  %vm610_vm2 = vweird.f32 %v2480_v62  ;;  %1434 = vperm.xlu2 %2478, %v2178_v43  }
 0x107   : > { %v583_v2 = vrot.slane %v582_v0, 2  ;;  %v566_v3 = vadd.f32 %v565_v63, %v564_v59  ;;  %vm611_vm4 = vmor %vm609_vm3, %vm610_vm2  ;;  %v2390_v63 = vld [vmem:[%s3171_s4 + $0x138] sm:$0xff] }
 0x108   : > { %v605_v5 = vmul.f32 %v2480_v62, %v604_v1  ;;  %1287 = vmatpush.bf16.xpose.msrb.mxu2 %v2390_v63 }
 0x109   : > { %v584_v6 = vadd.f32 %v583_v2, %v582_v0  ;;  %v567_v8 = vrot.slane %v566_v3, 1  ;;  %v2398_v0 = vld [vmem:[%s3171_s4 + $0x178] sm:$0xff] }
 0x10a   : > { %v606_v9 = vmul.f32 0.5, %v605_v5  ;;  %1306 = vmatpush.bf16.xpose.msrb.mxu3 %v2398_v0  ;;  %v2389_v5 = vld [vmem:[%s3171_s4 + $0x130] sm:$0xff] }
 0x10b   : > { %v568_v11 = vadd.f32 %v567_v8, %v566_v3  ;;  %v585_v13 = vrot.slane %v584_v6, 1 }
 0x10c   : > { %v607_v14 = vsub.f32 1.5, %v606_v9  ;;  %v481_v9 = vadd.s32 16, %v2771_v60 }
 0x10d   : > { %v586_v15 = vadd.f32 %v585_v13, %v584_v6  ;;  %v588_v16 = vmul.f32 0.0625, %v568_v11  ;;  %v2397_v6 = vld [vmem:[%s3171_s4 + $0x170] sm:$0xff]  ;;  %v2380_v11 = vld [vmem:[%s3171_s4 + $0xe8] sm:$0xff] }
 0x10e   : > { %v608_v17 = vmul.f32 %v2480_v62, %v607_v14  ;;  %1456 = vperm.xlu2 %2478, %v2181_v55   ;;  %v2388_v13 = vld [vmem:[%s3171_s4 + $0x128] sm:$0xff] }
 0x10f   : > { %v590_v18 = vmul.f32 0.0625, %v586_v15  ;;  %v592_v19 = vmul.f32 %v588_v16, %v588_v16  ;;  %v599_v46 = vsub.f32 %v2826_v49, %v588_v16  ;;  %v600_v47 = vsub.f32 %v2830_v52, %v588_v16  ;;  %v2382_v52 = vld [vmem:[%s3171_s4 + $0xf8] sm:$0xff]  ;;  %v2396_v14 = vld [vmem:[%s3171_s4 + $0x168] sm:$0xff] }
 0x110   : > { %v612_v22 = vsel %vm611_vm4, %v2480_v62, %v608_v17  ;;  %1268 = vmatpush.bf16.xpose.msrb.mxu1 %v2382_v52  ;;  %1288 = vmatpush.bf16.xpose.msrb.mxu2 %v2389_v5  ;;  %v501_v16 = vand.u32 15, %v481_v9  ;;  %v480_v17 = vadd.s32 8, %v2771_v60 }
 0x111   : > { %v594_v23 = vsub.f32 %v590_v18, %v592_v19  ;;  %v623_v24 = vmul.f32 %v612_v22, %v597_v20  ;;  %v624_v25 = vmul.f32 %v612_v22, %v598_v21  ;;  %v482_v19 = vadd.s32 24, %v2771_v60  ;;  %v2379_v22 = vld [vmem:[%s3171_s4 + $0xe0] sm:$0xff] }
 0x112   : > { %1307 = vmatpush.bf16.xpose.msrb.mxu3 %v2397_v6  ;;  %vm533_vm12 = vcmp.gt.s32.totalorder %v501_v16, 0  ;;  %v494_v20 = vand.u32 15, %v480_v17  ;;  %v2385_v6 = vld [vmem:[%s3171_s4 + $0x110] sm:$0xff] }
 0x113   : > { %v596_v27 = vmax.f32 %v594_v23, 0.0  ;;  %v639_v28 = vmul.f32 %v632_v4, %v623_v24  ;;  %v640_v29 = vmul.f32 %v637_v26, %v624_v25  ;;  %v2387_v23 = vld [vmem:[%s3171_s4 + $0x120] sm:$0xff] }
 0x114   : > { %v2395_v24 = vld [vmem:[%s3171_s4 + $0x160] sm:$0xff]  ;;  %vm544_vm14 = vcmp.lt.s32.totalorder %v494_v20, 15 }
 0x115   : > { %v602_v31 = vadd.f32 1e-05, %v596_v27  ;;  %v655_v32 = vadd.f32 %v648_v10, %v639_v28  ;;  %v656_v33 = vadd.f32 %v653_v30, %v640_v29  ;;  %v2556_v27 = vmov 0.0  }
 0x116   : > { %v2901_v28 = vsel %vm533_vm12, 1.0, %v2556_v27 }
 0x117   : > { %2481 = vrsqrt.f32 %v602_v31  ;;  %vm659_vm5 = vcmp.gt.f32.partialorder %v655_v32, 0.0  ;;  %v663_v7 = vmul.f32 0.2, %v655_v32  ;;  %vm660_vm6 = vcmp.gt.f32.partialorder %v656_v33, 0.0 }
 0x118   : > { %v664_v12 = vmul.f32 0.2, %v656_v33  ;;  %vm619_vm8 = vweird.f32 %v602_v31  ;;  %1289 = vmatpush.bf16.xpose.msrb.mxu2 %v2388_v13 }
 0x119   : > { %v667_v35 = vsel %vm659_vm5, %v655_v32, %v663_v7  ;;  %v487_v32 = vand.u32 15, %v2771_v60 }
 0x11a   : > { %v668_v36 = vsel %vm660_vm6, %v656_v33, %v664_v12  ;;  %1308 = vmatpush.bf16.xpose.msrb.mxu3 %v2396_v14 }
 0x11b   : > { %v671_v37 = vpack.c.bf16 %v668_v36, %v667_v35  ;;  %vm531_vm0 = vcmp.gt.s32.totalorder %v487_v32, 0 }
 0x11d   : > { %v2482_v39 = vpop.eup %2481  ;;  %873 = vmatmul.bf16.vlgmr.msra.gmra.mxu2 %v671_v37  ;;  %892 = vmatmul.bf16.vlgmr.msra.gmra.mxu3 %v671_v37 }
 0x11e   : > { %v614_v40 = vmul.f32 %v2482_v39, %v602_v31  ;;  %911 = vmatmul.bf16.vlgmr.msrb.gmra.mxu0 %v671_v37  ;;  %vm620_vm7 = vweird.f32 %v2482_v39  ;;  %v2910_v37 = vsel %vm544_vm14, 1.0, %v2556_v27 }
 0x11f   : > { %vm621_vm9 = vmor %vm619_vm8, %vm620_vm7 }
 0x120   : > { %v615_v41 = vmul.f32 %v2482_v39, %v614_v40  ;;  %1290 = vmatpush.bf16.xpose.msrb.mxu2 %v2387_v23 }
 0x122   : > { %v616_v42 = vmul.f32 0.5, %v615_v41  ;;  %1309 = vmatpush.bf16.xpose.msrb.mxu3 %v2395_v24 }
 0x124   : > { %v617_v44 = vsub.f32 1.5, %v616_v42 }
 0x126   : > { %v618_v45 = vmul.f32 %v2482_v39, %v617_v44  ;;  %v2378_v44 = vld [vmem:[%s3171_s4 + $0xd8] sm:$0xff] }
 0x128   : > { %v622_v48 = vsel %vm621_vm9, %v2482_v39, %v618_v45  ;;  %v2386_v45 = vld [vmem:[%s3171_s4 + $0x118] sm:$0xff] }
 0x129   : > { %v625_v50 = vmul.f32 %v622_v48, %v599_v46  ;;  %v626_v51 = vmul.f32 %v622_v48, %v600_v47  ;;  %v2394_v46 = vld [vmem:[%s3171_s4 + $0x158] sm:$0xff]  ;;  %1291 = vmatpush.bf16.xpose.msrb.mxu2 %v2386_v45 }
 0x12a   : > { %1310 = vmatpush.bf16.xpose.msrb.mxu3 %v2394_v46 }
 0x12b   : > { %v641_v53 = vmul.f32 %v632_v4, %v625_v50  ;;  %v642_v54 = vmul.f32 %v637_v26, %v626_v51  ;;  %v2381_v4 = vld [vmem:[%s3171_s4 + $0xf0] sm:$0xff]  ;;  %v2931_v50 = vsel %vm531_vm0, 1.0, %v2556_v27 }
 0x12c   : > { %1269 = vmatpush.bf16.xpose.msrb.mxu1 %v2381_v4 }
 0x12d   : > { %v657_v56 = vadd.f32 %v648_v10, %v641_v53  ;;  %v658_v57 = vadd.f32 %v653_v30, %v642_v54  ;;  %v508_v30 = vand.u32 15, %v482_v19 }
 0x12f   : > { %vm661_vm10 = vcmp.gt.f32.partialorder %v657_v56, 0.0  ;;  %v665_v58 = vmul.f32 0.2, %v657_v56  ;;  %vm662_vm11 = vcmp.gt.f32.partialorder %v658_v57, 0.0  ;;  %v666_v59 = vmul.f32 0.2, %v658_v57 }
 0x130   : > { %vm546_vm15 = vcmp.lt.s32.totalorder %v508_v30, 15  ;;  %v2392_v30 = vld [vmem:[%s3171_s4 + $0x148] sm:$0xff] }
 0x131   : > { %v669_v49 = vsel %vm661_vm10, %v657_v56, %v665_v58  ;;  %v670_v61 = vsel %vm662_vm11, %v658_v57, %v666_v59  ;;  %v2917_v43 = vsel %vm546_vm15, 1.0, %v2556_v27  ;;  %1292 = vmatpush.bf16.xpose.msrb.mxu2 %v2385_v6  ;;  %v2376_v27 = vld [vmem:[%s3171_s4 + $0xc8] sm:$0xff] }
 0x132   : > { %v672_v62 = vpack.c.bf16 %v670_v61, %v669_v49 }
 0x134   : > { %878 = vmatmul.bf16.gmra.mxu2 %v672_v62  ;;  %897 = vmatmul.bf16.gmra.mxu3 %v672_v62 }
 0x135   : > { %916 = vmatmul.bf16.gmra.mxu0 %v672_v62  ;;  %1270 = vmatpush.bf16.xpose.msrb.mxu1 %v2380_v11 }
 0x13d   : > { %1271 = vmatpush.bf16.xpose.msrb.mxu1 %v2379_v22 }
 0x145   : > { %1272 = vmatpush.bf16.xpose.msrb.mxu1 %v2378_v44 }
 0x19b   : > { %v2863_v1 = vpop.f32.mrf.mxu0 }
 0x19c   : > { %v939_v39 = vrot.slane %v2863_v1, 1 }
 0x1a0   : > { %v2865_v2 = vpop.f32.mrf.mxu2  ;;  %v2867_v3 = vpop.f32.mrf.mxu3 }
 0x1a1   : > { %v922_v36 = vrot.slane %v2865_v2, 7 }
 0x1a3   : > { %v2878_v8 = vpop.f32.mrf.mxu0 }
 0x1a4   : > { %v940_v7 = vrot.slane %v2878_v8, 1  ;;  %v2393_v8 = vld [vmem:[%s3171_s4 + $0x150] sm:$0xff] }
 0x1a5   : > { %1311 = vmatpush.bf16.xpose.msrb.mxu3 %v2393_v8 }
 0x1a6   : > { %v945_v0 = vsel %vm471_vm1, %v939_v39, %v940_v7 }
 0x1a8   : > { %v876_v10 = vpop.f32.mrf.mxu2  ;;  %v895_v15 = vpop.f32.mrf.mxu3 }
 0x1a9   : > { %v923_v25 = vrot.slane %v876_v10, 7 }
 0x1ab   : > { %v929_v40 = vsel %vm926_vm13, %v922_v36, %v923_v25 }
 0x1ac   : > { %v936_v53 = vadd.f32 %v929_v40, %v895_v15 }
 0x1ad   : > { %1312 = vmatpush.bf16.xpose.msrb.mxu3 %v2392_v30 }
 0x1b2   : > { %v917_v18 = vpop.f32.mrf.mxu0 }
 0x1b3   : > { %v941_v31 = vrot.slane %v917_v18, 1 }
 0x1b5   : > { %v944_v38 = vsel %vm471_vm1, %v940_v7, %v941_v31 }
 0x1b6   : > { %v948_v47 = vmul.f32 %v2910_v37, %v944_v38 }
 0x1b7   : > { %v879_v21 = vpop.f32.mrf.mxu2  ;;  %v898_v29 = vpop.f32.mrf.mxu3 }
 0x1b8   : > { %v924_v26 = vrot.slane %v879_v21, 7  ;;  %v2943_v62 = vadd.f32 %v948_v47, %v936_v53  ;;  %v2375_v47 = vld [vmem:[%s3171_s4 + $0xc0] sm:$0xff] }
 0x1ba   : > { %v928_v33 = vsel %vm926_vm13, %v923_v25, %v924_v26  ;;  %v919_v34 = vpop.f32.mrf.mxu0  ;;  %v970_v9 = vmul.f32 %v2943_v62, %v2943_v62 }
 0x1bb   : > { %v933_v12 = vmul.f32 %v2901_v28, %v928_v33  ;;  %v942_v35 = vrot.slane %v919_v34, 1 }
 0x1bd   : > { %v937_v41 = vadd.f32 %v933_v12, %v898_v29  ;;  %v946_v48 = vsel %vm471_vm1, %v942_v35, %v939_v39  ;;  %v943_v54 = vsel %vm471_vm1, %v941_v31, %v942_v35  ;;  %v2384_v29 = vld [vmem:[%s3171_s4 + $0x108] sm:$0xff] }
 0x1be   : > { %v950_v61 = vmul.f32 %v2917_v43, %v946_v48  ;;  %1293 = vmatpush.bf16.xpose.msrb.mxu2 %v2384_v29  ;;  %v2383_v48 = vld [vmem:[%s3171_s4 + $0x100] sm:$0xff] }
 0x1bf   : > { %v881_v42 = vpop.f32.mrf.mxu2  ;;  %v900_v56 = vpop.f32.mrf.mxu3  ;;  %v2939_v58 = vadd.f32 %v943_v54, %v937_v41 }
 0x1c0   : > { %v925_v51 = vrot.slane %v881_v42, 7 }
 0x1c1   : > { %v971_v1 = vmul.f32 %v2939_v58, %v2939_v58 }
 0x1c2   : > { %v930_v55 = vsel %vm926_vm13, %v925_v51, %v922_v36  ;;  %v927_v57 = vsel %vm926_vm13, %v924_v26, %v925_v51  ;;  %v2391_v51 = vld [vmem:[%s3171_s4 + $0x140] sm:$0xff] }
 0x1c3   : > { %v931_v59 = vmul.f32 %v2931_v50, %v930_v55  ;;  %v938_v49 = vadd.f32 %v927_v57, %v900_v56  ;;  %1313 = vmatpush.bf16.xpose.msrb.mxu3 %v2391_v51  ;;  %v2421_v51 = vld [vmem:[%s3171_s4 + $0x230] sm:$0xff] }
 0x1c5   : > { %v935_v52 = vadd.f32 %v931_v59, %v2867_v3  ;;  %v2946_v63 = vadd.f32 %v950_v61, %v938_v49  ;;  %v2377_v3 = vld [vmem:[%s3171_s4 + $0xd0] sm:$0xff] }
 0x1c6   : > { %1273 = vmatpush.bf16.xpose.msrb.mxu1 %v2377_v3  ;;  %1294 = vmatpush.bf16.xpose.msrb.mxu2 %v2383_v48  ;;  %v1033_v3 = vpop.permute.xlu2 %1032  ;;  %v2413_v48 = vld [vmem:[%s3171_s4 + $0x1f0] sm:$0xff] }
 0x1c7   : > { %v2952_v2 = vadd.f32 %v945_v0, %v935_v52  ;;  %v962_v4 = vadd.f32 %v2946_v63, %v2939_v58  ;;  %v972_v5 = vmul.f32 %v2946_v63, %v2946_v63 }
 0x1c9   : > { %v955_v10 = vadd.f32 %v2943_v62, %v2952_v2  ;;  %v969_v11 = vmul.f32 %v2952_v2, %v2952_v2  ;;  %v963_v13 = vrot.slane %v962_v4, 4  ;;  %v980_v14 = vadd.f32 %v972_v5, %v971_v1 }
 0x1cb   : > { %v956_v15 = vrot.slane %v955_v10, 4  ;;  %v973_v16 = vadd.f32 %v970_v9, %v969_v11  ;;  %v964_v17 = vadd.f32 %v963_v13, %v962_v4  ;;  %v981_v18 = vrot.slane %v980_v14, 4 }
 0x1cd   : > { %v974_v19 = vrot.slane %v973_v16, 4  ;;  %v965_v20 = vrot.slane %v964_v17, 2  ;;  %v982_v21 = vadd.f32 %v981_v18, %v980_v14  ;;  %v957_v22 = vadd.f32 %v956_v15, %v955_v10 }
 0x1ce   : > { %1274 = vmatpush.bf16.xpose.msrb.mxu1 %v2376_v27 }
 0x1cf   : > { %v975_v23 = vadd.f32 %v974_v19, %v973_v16  ;;  %v966_v24 = vadd.f32 %v965_v20, %v964_v17  ;;  %v983_v25 = vrot.slane %v982_v21, 2  ;;  %v958_v26 = vrot.slane %v957_v22, 2  ;;  %v1038_v20 = vpop.permute.xlu2 %1037 }
 0x1d1   : > { %v984_v31 = vadd.f32 %v983_v25, %v982_v21  ;;  %v959_v32 = vadd.f32 %v958_v26, %v957_v22  ;;  %v967_v33 = vrot.slane %v966_v24, 1  ;;  %v976_v34 = vrot.slane %v975_v23, 2  ;;  %v1055_v25 = vpop.permute.xlu1 %1054 }
 0x1d3   : > { %v985_v7 = vrot.slane %v984_v31, 1  ;;  %v960_v12 = vrot.slane %v959_v32, 1  ;;  %v968_v35 = vadd.f32 %v967_v33, %v966_v24  ;;  %v977_v36 = vadd.f32 %v976_v34, %v975_v23  ;;  %v1050_v24 = vpop.permute.xlu0 %1049 }
 0x1d5   : > { %v986_v38 = vadd.f32 %v985_v7, %v984_v31  ;;  %v961_v39 = vadd.f32 %v960_v12, %v959_v32  ;;  %v978_v40 = vrot.slane %v977_v36, 1  ;;  %v988_v41 = vmul.f32 0.0625, %v968_v35 }
 0x1d6   : > { %1275 = vmatpush.bf16.xpose.msrb.mxu1 %v2375_v47  ;;  %v2405_v47 = vld [vmem:[%s3171_s4 + $0x1b0] sm:$0xff] }
 0x1d7   : > { %v979_v42 = vadd.f32 %v978_v40, %v977_v36  ;;  %v987_v44 = vmul.f32 0.0625, %v961_v39  ;;  %v990_v45 = vmul.f32 0.0625, %v986_v38  ;;  %v992_v46 = vmul.f32 %v988_v41, %v988_v41 }
 0x1d8   : > { %v999_v26 = vsub.f32 %v2939_v58, %v988_v41 }
 0x1d9   : > { %v989_v53 = vmul.f32 0.0625, %v979_v42  ;;  %v991_v54 = vmul.f32 %v987_v44, %v987_v44  ;;  %v994_v55 = vsub.f32 %v990_v45, %v992_v46  ;;  %v997_v14 = vsub.f32 %v2952_v2, %v987_v44  ;;  %v2406_v42 = vld [vmem:[%s3171_s4 + $0x1b8] sm:$0xff] }
 0x1da   : > { %v998_v16 = vsub.f32 %v2943_v62, %v987_v44  ;;  %v1000_v2 = vsub.f32 %v2946_v63, %v988_v41  ;;  %v2414_v44 = vld [vmem:[%s3171_s4 + $0x1f8] sm:$0xff]  ;;  %1670 = vmatpush.bf16.xpose.msra.mxu0 %v2406_v42  ;;  %2425 = vmatpush.bf16.xpose.msra.mxu3 %v2406_v42 }
 0x1db   : > { %v993_v56 = vsub.f32 %v989_v53, %v991_v54  ;;  %v996_v57 = vmax.f32 %v994_v55, 0.0  ;;  %v2422_v45 = vld [vmem:[%s3171_s4 + $0x238] sm:$0xff] }
 0x1dc   : > { %1708 = vmatpush.bf16.xpose.msra.mxu2 %v2422_v45 }
 0x1dd   : > { %v995_v59 = vmax.f32 %v993_v56, 0.0  ;;  %v1002_v49 = vadd.f32 1e-05, %v996_v57  ;;  %v2404_v56 = vld [vmem:[%s3171_s4 + $0x1a8] sm:$0xff] }
 0x1de   : > { %1689 = vmatpush.bf16.xpose.msra.mxu1 %v2414_v44  ;;  %v2412_v57 = vld [vmem:[%s3171_s4 + $0x1e8] sm:$0xff] }
 0x1df   : > { %v1001_v61 = vadd.f32 1e-05, %v995_v59  ;;  %2483 = vrsqrt.f32 %v1002_v49  ;;  %vm1019_vm6 = vweird.f32 %v1002_v49  ;;  %v2420_v59 = vld [vmem:[%s3171_s4 + $0x228] sm:$0xff] }
 0x1e1   : > { %2485 = vrsqrt.f32 %v1001_v61  ;;  %vm1009_vm3 = vweird.f32 %v1001_v61 }
 0x1e2   : > { %1671 = vmatpush.bf16.xpose.msra.mxu0 %v2405_v47  ;;  %2426 = vmatpush.bf16.xpose.msra.mxu3 %v2405_v47 }
 0x1e4   : > { %1709 = vmatpush.bf16.xpose.msra.mxu2 %v2421_v51 }
 0x1e5   : > { %v2484_v52 = vpop.eup %2483 }
 0x1e6   : > { %v1014_v0 = vmul.f32 %v2484_v52, %v1002_v49  ;;  %vm1020_vm5 = vweird.f32 %v2484_v52  ;;  %1690 = vmatpush.bf16.xpose.msra.mxu1 %v2413_v48 }
 0x1e7   : > { %v2486_v1 = vpop.eup %2485  ;;  %vm1021_vm7 = vmor %vm1019_vm6, %vm1020_vm5 }
 0x1e8   : > { %v1004_v4 = vmul.f32 %v2486_v1, %v1001_v61  ;;  %v1015_v5 = vmul.f32 %v2484_v52, %v1014_v0  ;;  %vm1010_vm2 = vweird.f32 %v2486_v1  ;;  %v2403_v0 = vld [vmem:[%s3171_s4 + $0x1a0] sm:$0xff] }
 0x1e9   : > { %vm1011_vm4 = vmor %vm1009_vm3, %vm1010_vm2 }
 0x1ea   : > { %v1005_v6 = vmul.f32 %v2486_v1, %v1004_v4  ;;  %v1016_v8 = vmul.f32 0.5, %v1015_v5  ;;  %1672 = vmatpush.bf16.xpose.msra.mxu0 %v2404_v56  ;;  %2427 = vmatpush.bf16.xpose.msra.mxu3 %v2404_v56  ;;  %v2419_v4 = vld [vmem:[%s3171_s4 + $0x220] sm:$0xff] }
 0x1ec   : > { %v1006_v9 = vmul.f32 0.5, %v1005_v6  ;;  %v1017_v10 = vsub.f32 1.5, %v1016_v8  ;;  %1710 = vmatpush.bf16.xpose.msra.mxu2 %v2420_v59  ;;  %v2408_v59 = vld [vmem:[%s3171_s4 + $0x1c8] sm:$0xff] }
 0x1ee   : > { %v1007_v11 = vsub.f32 1.5, %v1006_v9  ;;  %v1018_v15 = vmul.f32 %v2484_v52, %v1017_v10  ;;  %1691 = vmatpush.bf16.xpose.msra.mxu1 %v2412_v57  ;;  %v2400_v57 = vld [vmem:[%s3171_s4 + $0x188] sm:$0xff] }
 0x1f0   : > { %v1008_v13 = vmul.f32 %v2486_v1, %v1007_v11  ;;  %v1022_v21 = vsel %vm1021_vm7, %v2484_v52, %v1018_v15  ;;  %v2410_v15 = vld [vmem:[%s3171_s4 + $0x1d8] sm:$0xff] }
 0x1f1   : > { %v1025_v30 = vmul.f32 %v1022_v21, %v999_v26  ;;  %v1026_v31 = vmul.f32 %v1022_v21, %v1000_v2 }
 0x1f2   : > { %v1012_v17 = vsel %vm1011_vm4, %v2486_v1, %v1008_v13  ;;  %v2411_v1 = vld [vmem:[%s3171_s4 + $0x1e0] sm:$0xff]  ;;  %1673 = vmatpush.bf16.xpose.msra.mxu0 %v2403_v0  ;;  %2428 = vmatpush.bf16.xpose.msra.mxu3 %v2403_v0 }
 0x1f3   : > { %v1023_v18 = vmul.f32 %v1012_v17, %v997_v14  ;;  %v1024_v19 = vmul.f32 %v1012_v17, %v998_v16  ;;  %v1042_v12 = vmul.f32 %v1033_v3, %v1025_v30  ;;  %v1043_v35 = vmul.f32 %v1038_v20, %v1026_v31  ;;  %v2402_v14 = vld [vmem:[%s3171_s4 + $0x198] sm:$0xff] }
 0x1f4   : > { %1711 = vmatpush.bf16.xpose.msra.mxu2 %v2419_v4  ;;  %v2418_v16 = vld [vmem:[%s3171_s4 + $0x218] sm:$0xff] }
 0x1f5   : > { %v1040_v22 = vmul.f32 %v1033_v3, %v1023_v18  ;;  %v1041_v23 = vmul.f32 %v1038_v20, %v1024_v19  ;;  %v1059_v36 = vadd.f32 %v1050_v24, %v1042_v12  ;;  %v1060_v58 = vadd.f32 %v1055_v25, %v1043_v35 }
 0x1f6   : > { %1692 = vmatpush.bf16.xpose.msra.mxu1 %v2411_v1 }
 0x1f7   : > { %v1057_v27 = vadd.f32 %v1050_v24, %v1040_v22  ;;  %v1058_v29 = vadd.f32 %v1055_v25, %v1041_v23  ;;  %v1067_v38 = vmul.f32 0.2, %v1059_v36  ;;  %v1068_v63 = vmul.f32 0.2, %v1060_v58 }
 0x1f8   : > { %vm1063_vm10 = vcmp.gt.f32.partialorder %v1059_v36, 0.0  ;;  %vm1064_vm11 = vcmp.gt.f32.partialorder %v1060_v58, 0.0 }
 0x1f9   : > { %v1065_v62 = vmul.f32 0.2, %v1057_v27  ;;  %v1066_v32 = vmul.f32 0.2, %v1058_v29  ;;  %vm1061_vm8 = vcmp.gt.f32.partialorder %v1057_v27, 0.0  ;;  %vm1062_vm9 = vcmp.gt.f32.partialorder %v1058_v29, 0.0 }
 0x1fa   : > { %v1071_v39 = vsel %vm1063_vm10, %v1059_v36, %v1067_v38  ;;  %v1072_v40 = vsel %vm1064_vm11, %v1060_v58, %v1068_v63  ;;  %1674 = vmatpush.bf16.xpose.msra.mxu0 %v2402_v14  ;;  %2429 = vmatpush.bf16.xpose.msra.mxu3 %v2402_v14 }
 0x1fb   : > { %v1069_v33 = vsel %vm1061_vm8, %v1057_v27, %v1065_v62  ;;  %v1070_v34 = vsel %vm1062_vm9, %v1058_v29, %v1066_v32  ;;  %v1074_v41 = vpack.c.bf16 %v1072_v40, %v1071_v39 }
 0x1fc   : > { %v1073_v7 = vpack.c.bf16 %v1070_v34, %v1069_v33  ;;  %1712 = vmatpush.bf16.xpose.msra.mxu2 %v2418_v16  ;;  %v2401_v33 = vld [vmem:[%s3171_s4 + $0x190] sm:$0xff] }
 0x1fd   : > { %v2409_v34 = vld [vmem:[%s3171_s4 + $0x1d0] sm:$0xff] }
 0x1fe   : > { %1276 = vmatmul.bf16.vlgmr.msrb.gmra.mxu1 %v1073_v7  ;;  %1295 = vmatmul.bf16.vlgmr.msrb.gmra.mxu2 %v1073_v7 }
 0x1ff   : > { %1314 = vmatmul.bf16.vlgmr.msrb.gmra.mxu3 %v1073_v7  ;;  %1693 = vmatpush.bf16.xpose.msra.mxu1 %v2410_v15  ;;  %v2417_v7 = vld [vmem:[%s3171_s4 + $0x210] sm:$0xff] }
 0x202   : > { %1675 = vmatpush.bf16.xpose.msra.mxu0 %v2401_v33  ;;  %2430 = vmatpush.bf16.xpose.msra.mxu3 %v2401_v33 }
 0x204   : > { %1713 = vmatpush.bf16.xpose.msra.mxu2 %v2417_v7 }
 0x207   : > { %1694 = vmatpush.bf16.xpose.msra.mxu1 %v2409_v34 }
 0x20a   : > { %1676 = vmatpush.bf16.xpose.msra.mxu0 %v2400_v57  ;;  %2431 = vmatpush.bf16.xpose.msra.mxu3 %v2400_v57  ;;  %v1440_v57 = vpop.permute.xlu0 %1439 }
 0x20e   : > { %1281 = vmatmul.bf16.gmra.mxu1 %v1074_v41  ;;  %1300 = vmatmul.bf16.gmra.mxu2 %v1074_v41 }
 0x20f   : > { %1319 = vmatmul.bf16.gmra.mxu3 %v1074_v41  ;;  %1695 = vmatpush.bf16.xpose.msra.mxu1 %v2408_v59 }
 0x27b   : > { %v1277_v46 = vpop.f32.mrf.mxu1 }
 0x27c   : > { %v1325_v9 = vrot.slane %v1277_v46, 7 }
 0x281   : > { %v1296_v53 = vpop.f32.mrf.mxu2 }
 0x282   : > { %v1315_v54 = vpop.f32.mrf.mxu3 }
 0x283   : > { %v1279_v55 = vpop.f32.mrf.mxu1  ;;  %v1341_v25 = vrot.slane %v1315_v54, 1 }
 0x284   : > { %v1326_v5 = vrot.slane %v1279_v55, 7 }
 0x286   : > { %v1331_v18 = vsel %vm926_vm13, %v1325_v9, %v1326_v5 }
 0x289   : > { %v1298_v49 = vpop.f32.mrf.mxu2 }
 0x28a   : > { %v1317_v61 = vpop.f32.mrf.mxu3  ;;  %v1338_v21 = vadd.f32 %v1331_v18, %v1298_v49  ;;  %v2416_v49 = vld [vmem:[%s3171_s4 + $0x208] sm:$0xff]  ;;  %v2407_v18 = vld [vmem:[%s3171_s4 + $0x1c0] sm:$0xff] }
 0x28b   : > { %v1282_v52 = vpop.f32.mrf.mxu1  ;;  %v1342_v10 = vrot.slane %v1317_v61, 1  ;;  %1714 = vmatpush.bf16.xpose.msra.mxu2 %v2416_v49  ;;  %1696 = vmatpush.bf16.xpose.msra.mxu1 %v2407_v18 }
 0x28c   : > { %v1327_v3 = vrot.slane %v1282_v52, 7 }
 0x28d   : > { %v1347_v29 = vsel %vm471_vm1, %v1341_v25, %v1342_v10 }
 0x28e   : > { %v1330_v19 = vsel %vm926_vm13, %v1326_v5, %v1327_v3 }
 0x28f   : > { %v1335_v26 = vmul.f32 %v2901_v28, %v1330_v19  ;;  %v2415_v19 = vld [vmem:[%s3171_s4 + $0x200] sm:$0xff] }
 0x291   : > { %v1301_v6 = vpop.f32.mrf.mxu2 }
 0x292   : > { %v1320_v8 = vpop.f32.mrf.mxu3  ;;  %v1339_v12 = vadd.f32 %v1335_v26, %v1301_v6 }
 0x293   : > { %v1343_v11 = vrot.slane %v1320_v8, 1  ;;  %v1284_v13 = vpop.f32.mrf.mxu1  ;;  %1715 = vmatpush.bf16.xpose.msra.mxu2 %v2415_v19 }
 0x294   : > { %v1328_v17 = vrot.slane %v1284_v13, 7 }
 0x295   : > { %v1346_v20 = vsel %vm471_vm1, %v1342_v10, %v1343_v11 }
 0x296   : > { %v1350_v22 = vmul.f32 %v2910_v37, %v1346_v20  ;;  %v1332_v23 = vsel %vm926_vm13, %v1328_v17, %v1325_v9  ;;  %v1329_v36 = vsel %vm926_vm13, %v1327_v3, %v1328_v17  ;;  %v2399_v17 = vld [vmem:[%s3171_s4 + $0x180] sm:$0xff] }
 0x297   : > { %v1333_v24 = vmul.f32 %v2931_v50, %v1332_v23  ;;  %1677 = vmatpush.bf16.xpose.msra.mxu0 %v2399_v17  ;;  %2432 = vmatpush.bf16.xpose.msra.mxu3 %v2399_v17 }
 0x298   : > { %v3051_v2 = vadd.f32 %v1350_v22, %v1338_v21 }
 0x299   : > { %v1337_v27 = vadd.f32 %v1333_v24, %v1296_v53  ;;  %v1303_v62 = vpop.f32.mrf.mxu2 }
 0x29a   : > { %v1322_v30 = vpop.f32.mrf.mxu3  ;;  %v1372_v35 = vmul.f32 %v3051_v2, %v3051_v2  ;;  %v1340_v40 = vadd.f32 %v1329_v36, %v1303_v62 }
 0x29b   : > { %v3055_v31 = vadd.f32 %v1347_v29, %v1337_v27  ;;  %v1344_v32 = vrot.slane %v1322_v30, 1 }
 0x29d   : > { %v1357_v58 = vadd.f32 %v3051_v2, %v3055_v31  ;;  %v1371_v38 = vmul.f32 %v3055_v31, %v3055_v31  ;;  %v1345_v63 = vsel %vm471_vm1, %v1343_v11, %v1344_v32  ;;  %v1348_v39 = vsel %vm471_vm1, %v1344_v32, %v1341_v25 }
 0x29e   : > { %v1352_v41 = vmul.f32 %v2917_v43, %v1348_v39  ;;  %v3079_v42 = vadd.f32 %v1345_v63, %v1339_v12  ;;  %v1435_v63 = vpop.permute.xlu2 %1434 }
 0x29f   : > { %v1358_v44 = vrot.slane %v1357_v58, 4  ;;  %v1375_v45 = vadd.f32 %v1372_v35, %v1371_v38 }
 0x2a0   : > { %v3081_v46 = vadd.f32 %v1352_v41, %v1340_v40  ;;  %v1373_v53 = vmul.f32 %v3079_v42, %v3079_v42 }
 0x2a1   : > { %v1359_v47 = vadd.f32 %v1358_v44, %v1357_v58  ;;  %v1376_v48 = vrot.slane %v1375_v45, 4 }
 0x2a2   : > { %v1364_v51 = vadd.f32 %v3081_v46, %v3079_v42  ;;  %v1374_v54 = vmul.f32 %v3081_v46, %v3081_v46 }
 0x2a3   : > { %v1360_v55 = vrot.slane %v1359_v47, 2  ;;  %v1377_v56 = vadd.f32 %v1376_v48, %v1375_v45 }
 0x2a4   : > { %v1365_v61 = vrot.slane %v1364_v51, 4  ;;  %v1382_v52 = vadd.f32 %v1374_v54, %v1373_v53 }
 0x2a5   : > { %v1361_v0 = vadd.f32 %v1360_v55, %v1359_v47  ;;  %v1378_v1 = vrot.slane %v1377_v56, 2 }
 0x2a6   : > { %v1366_v4 = vadd.f32 %v1365_v61, %v1364_v51  ;;  %v1383_v5 = vrot.slane %v1382_v52, 4 }
 0x2a7   : > { %v1362_v3 = vrot.slane %v1361_v0, 1  ;;  %v1379_v6 = vadd.f32 %v1378_v1, %v1377_v56 }
 0x2a8   : > { %v1367_v8 = vrot.slane %v1366_v4, 2  ;;  %v1384_v9 = vadd.f32 %v1383_v5, %v1382_v52  ;;  %v1452_v52 = vpop.permute.xlu1 %1451 }
 0x2a9   : > { %v1363_v10 = vadd.f32 %v1362_v3, %v1361_v0  ;;  %v1380_v11 = vrot.slane %v1379_v6, 1  ;;  %v1457_v0 = vpop.permute.xlu2 %1456 }
 0x2aa   : > { %v1368_v13 = vadd.f32 %v1367_v8, %v1366_v4  ;;  %v1385_v14 = vrot.slane %v1384_v9, 2 }
 0x2ab   : > { %v1381_v15 = vadd.f32 %v1380_v11, %v1379_v6  ;;  %v1389_v16 = vmul.f32 0.0625, %v1363_v10 }
 0x2ac   : > { %v1369_v20 = vrot.slane %v1368_v13, 1  ;;  %v1386_v21 = vadd.f32 %v1385_v14, %v1384_v9 }
 0x2ad   : > { %v1391_v22 = vmul.f32 0.0625, %v1381_v15  ;;  %v1393_v23 = vmul.f32 %v1389_v16, %v1389_v16  ;;  %v1399_v47 = vsub.f32 %v3055_v31, %v1389_v16  ;;  %v1400_v51 = vsub.f32 %v3051_v2, %v1389_v16 }
 0x2ae   : > { %v1370_v24 = vadd.f32 %v1369_v20, %v1368_v13  ;;  %v1387_v25 = vrot.slane %v1386_v21, 1 }
 0x2af   : > { %v1395_v26 = vsub.f32 %v1391_v22, %v1393_v23 }
 0x2b0   : > { %v1388_v27 = vadd.f32 %v1387_v25, %v1386_v21  ;;  %v1390_v29 = vmul.f32 0.0625, %v1370_v24 }
 0x2b1   : > { %v1397_v30 = vmax.f32 %v1395_v26, 0.0 }
 0x2b2   : > { %v1392_v62 = vmul.f32 0.0625, %v1388_v27  ;;  %v1394_v32 = vmul.f32 %v1390_v29, %v1390_v29  ;;  %v1401_v1 = vsub.f32 %v3079_v42, %v1390_v29  ;;  %v1402_v31 = vsub.f32 %v3081_v46, %v1390_v29 }
 0x2b3   : > { %v1403_v33 = vadd.f32 1e-05, %v1397_v30 }
 0x2b4   : > { %v1396_v34 = vsub.f32 %v1392_v62, %v1394_v32 }
 0x2b5   : > { %2487 = vrsqrt.f32 %v1403_v33  ;;  %vm1411_vm14 = vweird.f32 %v1403_v33 }
 0x2b6   : > { %v1398_v7 = vmax.f32 %v1396_v34, 0.0 }
 0x2b8   : > { %v1404_v12 = vadd.f32 1e-05, %v1398_v7 }
 0x2ba   : > { %2489 = vrsqrt.f32 %v1404_v12  ;;  %vm1421_vm2 = vweird.f32 %v1404_v12 }
 0x2bb   : > { %v2488_v35 = vpop.eup %2487 }
 0x2bc   : > { %v1406_v36 = vmul.f32 %v2488_v35, %v1403_v33  ;;  %vm1412_vm12 = vweird.f32 %v2488_v35 }
 0x2bd   : > { %vm1413_vm15 = vmor %vm1411_vm14, %vm1412_vm12 }
 0x2be   : > { %v1407_v58 = vmul.f32 %v2488_v35, %v1406_v36 }
 0x2c0   : > { %v2490_v38 = vpop.eup %2489  ;;  %v1408_v39 = vmul.f32 0.5, %v1407_v58 }
 0x2c1   : > { %v1416_v40 = vmul.f32 %v2490_v38, %v1404_v12  ;;  %vm1422_vm0 = vweird.f32 %v2490_v38 }
 0x2c2   : > { %v1409_v41 = vsub.f32 1.5, %v1408_v39  ;;  %vm1423_vm3 = vmor %vm1421_vm2, %vm1422_vm0 }
 0x2c3   : > { %v1417_v44 = vmul.f32 %v2490_v38, %v1416_v40 }
 0x2c4   : > { %v1410_v45 = vmul.f32 %v2488_v35, %v1409_v41 }
 0x2c5   : > { %v1418_v48 = vmul.f32 0.5, %v1417_v44 }
 0x2c6   : > { %v1414_v53 = vsel %vm1413_vm15, %v2488_v35, %v1410_v45 }
 0x2c7   : > { %v1425_v54 = vmul.f32 %v1414_v53, %v1399_v47  ;;  %v1419_v55 = vsub.f32 1.5, %v1418_v48  ;;  %v1426_v56 = vmul.f32 %v1414_v53, %v1400_v51 }
 0x2c9   : > { %v1420_v59 = vmul.f32 %v2490_v38, %v1419_v55  ;;  %v1442_v49 = vmul.f32 %v1435_v63, %v1425_v54  ;;  %v1443_v61 = vmul.f32 %v1440_v57, %v1426_v56 }
 0x2cb   : > { %v1424_v4 = vsel %vm1423_vm3, %v2490_v38, %v1420_v59  ;;  %v1459_v5 = vadd.f32 %v1452_v52, %v1442_v49  ;;  %v1460_v2 = vadd.f32 %v1457_v0, %v1443_v61 }
 0x2cc   : > { %v1427_v3 = vmul.f32 %v1424_v4, %v1401_v1  ;;  %v1428_v6 = vmul.f32 %v1424_v4, %v1402_v31 }
 0x2cd   : > { %vm1463_vm4 = vcmp.gt.f32.partialorder %v1459_v5, 0.0  ;;  %vm1464_vm5 = vcmp.gt.f32.partialorder %v1460_v2, 0.0  ;;  %v1467_v8 = vmul.f32 0.2, %v1459_v5  ;;  %v1468_v9 = vmul.f32 0.2, %v1460_v2 }
 0x2ce   : > { %v1444_v10 = vmul.f32 %v1435_v63, %v1427_v3  ;;  %v1445_v11 = vmul.f32 %v1440_v57, %v1428_v6 }
 0x2cf   : > { %v1471_v13 = vsel %vm1463_vm4, %v1459_v5, %v1467_v8  ;;  %v1472_v14 = vsel %vm1464_vm5, %v1460_v2, %v1468_v9 }
 0x2d0   : > { %v1475_v15 = vpack.c.bf16 %v1472_v14, %v1471_v13  ;;  %v1461_v16 = vadd.f32 %v1452_v52, %v1444_v10  ;;  %v1462_v17 = vadd.f32 %v1457_v0, %v1445_v11 }
 0x2d2   : > { %1678 = vmatmul.bf16.vlgmr.msra.gmra.mxu0 %v1475_v15  ;;  %1697 = vmatmul.bf16.vlgmr.msra.gmra.mxu1 %v1475_v15  ;;  %vm1465_vm6 = vcmp.gt.f32.partialorder %v1461_v16, 0.0  ;;  %vm1466_vm7 = vcmp.gt.f32.partialorder %v1462_v17, 0.0  ;;  %v1469_v42 = vmul.f32 0.2, %v1461_v16  ;;  %v1470_v46 = vmul.f32 0.2, %v1462_v17 }
 0x2d3   : > { %1716 = vmatmul.bf16.vlgmr.msra.gmra.mxu2 %v1475_v15 }
 0x2d4   : > { %v1473_v18 = vsel %vm1465_vm6, %v1461_v16, %v1469_v42  ;;  %v1474_v19 = vsel %vm1466_vm7, %v1462_v17, %v1470_v46 }
 0x2d5   : > { %v1476_v20 = vpack.c.bf16 %v1474_v19, %v1473_v18 }
 0x2d7   : > { %1683 = vmatmul.bf16.vlgmr.msra.gmra.mxu3 %v1476_v20 }
 0x2e2   : > { %1702 = vmatmul.bf16.gmra.mxu1 %v1476_v20 }
 0x2e3   : > { %1721 = vmatmul.bf16.gmra.mxu2 %v1476_v20 }
 0x34f   : > { %v1698_v21 = vpop.f32.mrf.mxu1  ;;  %v1679_v22 = vpop.f32.mrf.mxu0 }
 0x350   : > { %v1727_v30 = vrot.slane %v1679_v22, 7 }
 0x356   : > { %v1717_v23 = vpop.f32.mrf.mxu2 }
 0x357   : > { %v1700_v25 = vpop.f32.mrf.mxu1  ;;  %v1681_v27 = vpop.f32.mrf.mxu0  ;;  %v1743_v58 = vrot.slane %v1717_v23, 1 }
 0x358   : > { %v1728_v62 = vrot.slane %v1681_v27, 7 }
 0x35a   : > { %v1684_v24 = vpop.f32.mrf.mxu3  ;;  %v1733_v38 = vsel %vm926_vm13, %v1727_v30, %v1728_v62 }
 0x35b   : > { %v1729_v33 = vrot.slane %v1684_v24, 7  ;;  %v1740_v45 = vadd.f32 %v1733_v38, %v1700_v25 }
 0x35d   : > { %v1732_v41 = vsel %vm926_vm13, %v1728_v62, %v1729_v33 }
 0x35e   : > { %v1719_v26 = vpop.f32.mrf.mxu2  ;;  %v1737_v48 = vmul.f32 %v2901_v28, %v1732_v41 }
 0x35f   : > { %v1744_v34 = vrot.slane %v1719_v26, 1  ;;  %v1703_v7 = vpop.f32.mrf.mxu1 }
 0x360   : > { %v1741_v56 = vadd.f32 %v1737_v48, %v1703_v7 }
 0x361   : > { %v1749_v40 = vsel %vm471_vm1, %v1743_v58, %v1744_v34 }
 0x362   : > { %v1686_v29 = vpop.f32.mrf.mxu3 }
 0x363   : > { %v1730_v32 = vrot.slane %v1686_v29, 7 }
 0x365   : > { %v1734_v12 = vsel %vm926_vm13, %v1730_v32, %v1727_v30 }
 0x366   : > { %v1735_v35 = vmul.f32 %v2931_v50, %v1734_v12  ;;  %v1722_v36 = vpop.f32.mrf.mxu2 }
 0x367   : > { %v1745_v63 = vrot.slane %v1722_v36, 1  ;;  %v1705_v54 = vpop.f32.mrf.mxu1 }
 0x368   : > { %v1739_v39 = vadd.f32 %v1735_v35, %v1698_v21 }
 0x369   : > { %v1748_v44 = vsel %vm471_vm1, %v1744_v34, %v1745_v63 }
 0x36a   : > { %v1755_v47 = vadd.f32 %v1749_v40, %v1739_v39  ;;  %v1752_v50 = vmul.f32 %v2910_v37, %v1748_v44  ;;  %v1731_v37 = vsel %vm926_vm13, %v1729_v33, %v1730_v32 }
 0x36b   : > { %v1742_v59 = vadd.f32 %v1731_v37, %v1705_v54 }
 0x36c   : > { %1759 = vst [vmem:[%s218_s30] sm:$0xff] %v1755_v47  ;;  %v1756_v51 = vadd.f32 %v1752_v50, %v1740_v45 }
 0x36e   : > { %1760 = vst [vmem:[%s218_s30 + $0x8] sm:$0xff] %v1756_v51  ;;  %v1724_v53 = vpop.f32.mrf.mxu2 }
 0x36f   : > { %v1746_v55 = vrot.slane %v1724_v53, 1 }
 0x371   : > { %v1747_v28 = vsel %vm471_vm1, %v1745_v63, %v1746_v55  ;;  %v1750_v57 = vsel %vm471_vm1, %v1746_v55, %v1743_v58 }
 0x372   : > { %v1754_v49 = vmul.f32 %v2917_v43, %v1750_v57  ;;  %v1757_v61 = vadd.f32 %v1747_v28, %v1741_v56 }
 0x374   : > { %v1758_v52 = vadd.f32 %v1754_v49, %v1742_v59  ;;  %1761 = vst [vmem:[%s218_s30 + $0x10] sm:$0xff] %v1757_v61 }
 0x376   : > { %1762 = vst [vmem:[%s218_s30 + $0x18] sm:$0xff] %v1758_v52 }
 0x377   : > { %2518 = shalt.err (!%p2515_p3)
}
 0x378   : > { %s2557_s23 = smov 128   ;;  %s2558_s25 = smov 8  }
 0x379   : > { %2433 = dma.vmem_to_hbm [thread:$0]  (%p2627_p5), %s1778_s10, 512, %s1780_s11, %s1764_s22, %s2557_s23, %s2557_s23, %s2558_s25  }
 0x37a PF: > { %p2439_p4 = scmp.ge.s32.totalorder %s2553_s21, 2  ;;  %s1794_s26 = sand.u32 1, %s2541_s18  }
 0x37b   : > { %s1795_s30 = scalar_lea.sflag [#allocation3], %s1794_s26 }
 0x37c   : > { %p2436_p7 = pnand %p2439_p4, %p2631_p6 }
 0x37e   : > { %p2437_p8 = pneg %p2436_p7 }
 0x380   : > { %2536 = dma.done.wait (%p2437_p8), %s1795_s30, 512  }
 0x381   : > { %2538 = vsyncadd (%p2437_p8), %s1795_s30, 4294966784  ;;  %p15_p9 = scmp.ge.s32.totalorder %s2614_s24, 4   ;;  %s3175_s18 = smov %s2545_s19 }
 0x382   : > { %s3176_s19 = smov %s2549_s20  ;;  %s3177_s20 = smov %s2625_s27 }
 0x383   : > { %s3178_s21 = smov %s2614_s24  ;;  %17 = sbr.rel (!%p15_p9) target bundleno = 3 (0x3), region = 81 }
 0x388   :  { %1801 = vsyncpa [#allocation3], 1 }
 0x389   :  { %1803 = vsyncpa [#allocation3 + $0x1], 1 }

</bundles_post_ra>
